<compile_context>
chip_gen: v7x
topology: tpu7x:2x2x1
jax: 0.10.0
libtpu: 0.0.40
codegen_flags: <defaults>
</compile_context>

<pallas_src>
import math

import jax
import jax.numpy as jnp
from jax import lax
from jax.experimental import pallas as pl
from jax.experimental.pallas import tpu as pltpu

# ---------------- model dimensions (small, synthetic, lane-aligned) ----------
VOCAB = 64          # vocabulary size
B     = 2           # batch
S     = 8           # sequence length
H     = 128         # hidden size == head_dim (single head), lane-aligned
FFN   = 256         # SwiGLU intermediate size
NUM_LAYERS = 3                                  # layers in the synthetic base model
RESIDUAL_LAYER_IDX = int(NUM_LAYERS * 2 / 3)    # = 2, as in the PyTorch default
L_RUN = RESIDUAL_LAYER_IDX                      # layers actually executed (0..idx-1)
EPS   = 1e-6
M     = B * S                                   # flattened token count (16)

# contract the last (lane) dim of both operands: q @ k^T without an explicit .T
_NT = (((1,), (1,)), ((), ()))


def _last_token_rows(a):
    """(B*S, D) -> (B, D): row S-1 of every batch (sublane gather)."""
    return a.reshape(B, S, a.shape[-1])[:, S - 1, :]


def _llama_residual_kernel(emb_ref, bias_ref, bias_last_ref, cos_ref, sin_ref,
                           wqkv_ref, wo_ref, wgu_ref, wd_ref, out_ref):
    """Single grid step; whole problem resident in VMEM.

    emb_ref       : (B*S, H)      f32   token embeddings (residual at layer-0 input)
    bias_ref      : (B*S, B*S)    f32   block-diag additive attention bias
    bias_last_ref : (B,   B*S)    f32   bias rows for the last token of each batch
    cos_ref       : (B*S, H)      f32   RoPE cos table
    sin_ref       : (B*S, H)      f32   RoPE sin table with rotate_half sign folded in
    wqkv_ref      : (L, H, 3H)    bf16  fused Q|K|V (gamma1 and 1/sqrt(H) folded in)
    wo_ref        : (L, H, H)     bf16  attention output projection
    wgu_ref       : (L, H, 2F)    bf16  fused gate|up (gamma2 folded in)
    wd_ref        : (L, F, H)     bf16  SwiGLU down projection
    out_ref       : (B, H)        f32   residual entering layer L at the last token
    """
    h = emb_ref[...]
    cos = cos_ref[...]
    sin_s = sin_ref[...]
    bias = bias_ref[...]
    bias_last = bias_last_ref[...]

    def rmsnorm(x):                       # gamma already folded into the weights
        return x * lax.rsqrt(jnp.mean(x * x, axis=-1, keepdims=True) + EPS)

    def rope(x):                          # rotate_half sign folded into sin_s
        return x * cos + pltpu.roll(x, shift=H // 2, axis=1) * sin_s

    def softmax_rows(s):                  # exact up to the approx EUP reciprocal
        m_ = jnp.max(s, axis=-1, keepdims=True)
        e = jnp.exp(s - m_)
        return e * pl.reciprocal(jnp.sum(e, axis=-1, keepdims=True), approx=True)

    for l in range(L_RUN):                # static unroll over executed layers
        last = (l == L_RUN - 1)

        # ---- self-attention block ----
        xb = rmsnorm(h).astype(jnp.bfloat16)                     # one cast, reused
        qkv = jnp.dot(xb, wqkv_ref[l],
                      preferred_element_type=jnp.float32)        # (M, 3H), one MXU issue
        q = rope(qkv[:, :H])              # 1/sqrt(H) folded into Wq host-side
        k = rope(qkv[:, H:2 * H]).astype(jnp.bfloat16)
        v = qkv[:, 2 * H:].astype(jnp.bfloat16)

        if not last:
            s = lax.dot_general(q.astype(jnp.bfloat16), k, _NT,
                                preferred_element_type=jnp.float32) + bias   # (M, M)
            ctx = jnp.dot(softmax_rows(s).astype(jnp.bfloat16), v,
                          preferred_element_type=jnp.float32)                # (M, H)
            h = h + jnp.dot(ctx.astype(jnp.bfloat16), wo_ref[l],
                            preferred_element_type=jnp.float32)

            # ---- SwiGLU MLP block ----
            xb2 = rmsnorm(h).astype(jnp.bfloat16)
            gu = jnp.dot(xb2, wgu_ref[l],
                         preferred_element_type=jnp.float32)                 # (M, 2F)
            act = (jax.nn.silu(gu[:, :FFN]) * gu[:, FFN:]).astype(jnp.bfloat16)
            h = h + jnp.dot(act, wd_ref[l], preferred_element_type=jnp.float32)
        else:
            # Only the last-token residual is hooked: prune Q / attn-out / Wo / MLP
            # to the B last-token rows; K/V (computed above) stay full-row.
            q_l = _last_token_rows(q).astype(jnp.bfloat16)       # (B, H)
            h_l = _last_token_rows(h)                            # (B, H)
            s = lax.dot_general(q_l, k, _NT,
                                preferred_element_type=jnp.float32) + bias_last  # (B, M)
            ctx = jnp.dot(softmax_rows(s).astype(jnp.bfloat16), v,
                          preferred_element_type=jnp.float32)                     # (B, H)
            h_l = h_l + jnp.dot(ctx.astype(jnp.bfloat16), wo_ref[l],
                                preferred_element_type=jnp.float32)

            xb2 = rmsnorm(h_l).astype(jnp.bfloat16)
            gu = jnp.dot(xb2, wgu_ref[l],
                         preferred_element_type=jnp.float32)                      # (B, 2F)
            act = (jax.nn.silu(gu[:, :FFN]) * gu[:, FFN:]).astype(jnp.bfloat16)
            h_l = h_l + jnp.dot(act, wd_ref[l], preferred_element_type=jnp.float32)

            out_ref[...] = h_l.astype(out_ref.dtype)

    if L_RUN == 0:                        # degenerate case: hook on layer 0
        out_ref[...] = _last_token_rows(h).astype(out_ref.dtype)


def llama_residual_forward(emb, bias, bias_last, cos, sin_s, wqkv, wo, wgu, wd):
    """[B*S, H] residual stream in -> [B, H] residual entering layer idx, last token."""
    args = (emb, bias, bias_last, cos, sin_s, wqkv, wo, wgu, wd)
    vmem_spec = pl.BlockSpec(memory_space=pltpu.MemorySpace.VMEM)

    # Advisory cost estimate for XLA scheduling around the custom call.
    def mm(m, k, n):
        return 2 * m * k * n
    full_layer = (mm(M, H, 3 * H) + mm(M, H, M) + mm(M, M, H) + mm(M, H, H)
                  + mm(M, H, 2 * FFN) + mm(M, FFN, H))
    last_layer = (mm(M, H, 3 * H) + mm(B, H, M) + mm(B, M, H) + mm(B, H, H)
                  + mm(B, H, 2 * FFN) + mm(B, FFN, H))
    flops = max(L_RUN - 1, 0) * full_layer + (last_layer if L_RUN > 0 else 0)
    transcendentals = (max(L_RUN - 1, 0) * (M * M + M * FFN)
                       + (B * M + B * FFN if L_RUN > 0 else 0))
    bytes_accessed = sum(int(a.size) * a.dtype.itemsize for a in args) + B * H * 4

    # Single gridless kernel invocation: every operand is a whole-array VMEM
    # block, nothing is re-DMA'd and there is no per-step pipeline overhead.
    # (On v7x this runs on one TensorCore; a 'parallel' batch grid axis only
    # pays off at larger B / layer counts.)
    return pl.pallas_call(
        _llama_residual_kernel,
        out_shape=jax.ShapeDtypeStruct((B, H), jnp.float32),
        in_specs=[vmem_spec] * len(args),
        out_specs=vmem_spec,
        cost_estimate=pl.CostEstimate(flops=flops,
                                      transcendentals=transcendentals,
                                      bytes_accessed=bytes_accessed),
    )(*args)


def init_params(key):
    """Deterministic synthetic Llama master parameters (f32)."""
    ks = jax.random.split(key, 10)
    emb_table = jax.random.normal(ks[0], (VOCAB, H), jnp.float32) * 0.02
    sh = 1.0 / math.sqrt(H)
    sf = 1.0 / math.sqrt(FFN)
    g1 = 1.0 + 0.1 * jax.random.normal(ks[1], (L_RUN, 1, H), jnp.float32)
    g2 = 1.0 + 0.1 * jax.random.normal(ks[2], (L_RUN, 1, H), jnp.float32)
    wq = jax.random.normal(ks[3], (L_RUN, H, H), jnp.float32) * sh
    wk = jax.random.normal(ks[4], (L_RUN, H, H), jnp.float32) * sh
    wv = jax.random.normal(ks[5], (L_RUN, H, H), jnp.float32) * sh
    wo = jax.random.normal(ks[6], (L_RUN, H, H), jnp.float32) * sh
    wg = jax.random.normal(ks[7], (L_RUN, H, FFN), jnp.float32) * sh
    wu = jax.random.normal(ks[8], (L_RUN, H, FFN), jnp.float32) * sh
    wd = jax.random.normal(ks[9], (L_RUN, FFN, H), jnp.float32) * sf
    return (g1, g2, wq, wk, wv, wo, wg, wu, wd), emb_table


def prepare_inputs(params, emb_table, input_ids, attention_mask):
    """Host-side folds/fusions (all exact in real arithmetic): QKV + gate/up fusion,
    gamma / attention-scale / rotate_half-sign folding, block-diagonal bias."""
    g1, g2, wq, wk, wv, wo, wg, wu, wd = params

    attn_scale = 1.0 / math.sqrt(H)
    # diag(g1) @ [Wq*scale | Wk | Wv]  (RoPE is linear, so pre-scaling Wq is exact)
    wqkv = (jnp.swapaxes(g1, 1, 2)
            * jnp.concatenate([wq * attn_scale, wk, wv], axis=-1)).astype(jnp.bfloat16)
    # diag(g2) @ [Wg | Wu]
    wgu = (jnp.swapaxes(g2, 1, 2)
           * jnp.concatenate([wg, wu], axis=-1)).astype(jnp.bfloat16)
    wo_b = wo.astype(jnp.bfloat16)
    wd_b = wd.astype(jnp.bfloat16)

    # TODO(synk): embedding-table gather stays in plain JAX glue.
    emb = emb_table[input_ids].reshape(M, H).astype(jnp.float32)

    # Block-diagonal (B*S, B*S) bias: causal + key padding inside a batch,
    # -1e9 across batches (so flat 2-D attention matches per-batch attention).
    causal = jnp.tril(jnp.ones((S, S), dtype=bool))
    key_ok = attention_mask.astype(bool)                       # (B, S)
    allowed = causal[None, :, :] & key_ok[:, None, :]          # (B, S, S)
    bias = jnp.full((M, M), -1e9, jnp.float32)
    for b in range(B):
        bias = bias.at[b * S:(b + 1) * S, b * S:(b + 1) * S].set(
            jnp.where(allowed[b], 0.0, -1e9))
    bias_last = bias[S - 1::S]                                 # (B, M)

    # RoPE tables; rotate_half sign ([-1]*H/2 ++ [+1]*H/2) folded into sin.
    pos = jnp.arange(S, dtype=jnp.float32)
    inv_freq = 1.0 / (10000.0 ** (jnp.arange(0, H, 2, dtype=jnp.float32) / H))
    ang = jnp.concatenate([pos[:, None] * inv_freq[None, :]] * 2, axis=-1)   # (S, H)
    sign = jnp.where(jnp.arange(H) < H // 2, -1.0, 1.0).astype(jnp.float32)
    cos = jnp.tile(jnp.cos(ang), (B, 1)).astype(jnp.float32)                 # (M, H)
    sin_s = (jnp.tile(jnp.sin(ang), (B, 1)) * sign[None, :]).astype(jnp.float32)

    return emb, bias, bias_last, cos, sin_s, wqkv, wo_b, wgu, wd_b


def ref_forward(emb, bias, cos, sin_s, wqkv, wo, wgu, wd):
    """Pure-JAX reference on the same prepared arrays (bf16 dots, exact softmax,
    full last layer — also validates the last-layer pruning in the kernel)."""
    def rmsnorm(x):
        return x * lax.rsqrt(jnp.mean(x * x, axis=-1, keepdims=True) + EPS)

    def rope(x):
        rolled = jnp.concatenate([x[:, H // 2:], x[:, :H // 2]], axis=-1)
        return x * cos + rolled * sin_s

    h = emb
    for l in range(L_RUN):
        xb = rmsnorm(h).astype(jnp.bfloat16)
        qkv = jnp.dot(xb, wqkv[l], preferred_element_type=jnp.float32)
        q = rope(qkv[:, :H])
        k = rope(qkv[:, H:2 * H])
        v = qkv[:, 2 * H:]
        s = lax.dot_general(q.astype(jnp.bfloat16), k.astype(jnp.bfloat16), _NT,
                            preferred_element_type=jnp.float32) + bias
        p = jax.nn.softmax(s, axis=-1)
        ctx = jnp.dot(p.astype(jnp.bfloat16), v.astype(jnp.bfloat16),
                      preferred_element_type=jnp.float32)
        h = h + jnp.dot(ctx.astype(jnp.bfloat16), wo[l],
                        preferred_element_type=jnp.float32)
        xb2 = rmsnorm(h).astype(jnp.bfloat16)
        gu = jnp.dot(xb2, wgu[l], preferred_element_type=jnp.float32)
        h = h + jnp.dot((jax.nn.silu(gu[:, :FFN]) * gu[:, FFN:]).astype(jnp.bfloat16),
                        wd[l], preferred_element_type=jnp.float32)
    return h.reshape(B, S, H)[:, S - 1, :]


if __name__ == "__main__":
    key = jax.random.PRNGKey(0)
    k_ids, k_par = jax.random.split(key)

    # Synthetic batch: input_ids [B, S] int32, attention_mask [B, S] int32
    input_ids = jax.random.randint(k_ids, (B, S), 0, VOCAB, dtype=jnp.int32)
    attention_mask = jnp.ones((B, S), jnp.int32).at[1, S - 2:].set(0)  # row 1 padded

    params, emb_table = init_params(k_par)
    (emb, bias, bias_last, cos, sin_s,
     wqkv, wo_b, wgu, wd_b) = prepare_inputs(params, emb_table, input_ids, attention_mask)

    out = llama_residual_forward(emb, bias, bias_last, cos, sin_s, wqkv, wo_b, wgu, wd_b)
    out = jax.block_until_ready(out)

    expected = ref_forward(emb, bias, cos, sin_s, wqkv, wo_b, wgu, wd_b)

    assert out.shape == (B, H)
    assert bool(jnp.all(jnp.isfinite(out)))
    # Only deliberate deviations vs reference: approx EUP reciprocal in softmax
    # and MXU vs XLA matmul rounding -> loose-ish tolerance.
    assert bool(jnp.allclose(out, expected, atol=3e-2, rtol=3e-2)), "mismatch vs reference"

    print("KERNEL_OK")
</pallas_src>

<mosaic_0001>
module attributes {stable_mosaic.version = 11 : i64} {
  func.func @_llama_residual_kernel(%arg0: memref<16x128xf32, #tpu.memory_space<vmem>>, %arg1: memref<16x16xf32, #tpu.memory_space<vmem>>, %arg2: memref<2x16xf32, #tpu.memory_space<vmem>>, %arg3: memref<16x128xf32, #tpu.memory_space<vmem>>, %arg4: memref<16x128xf32, #tpu.memory_space<vmem>>, %arg5: memref<2x128x384xbf16, #tpu.memory_space<vmem>>, %arg6: memref<2x128x128xbf16, #tpu.memory_space<vmem>>, %arg7: memref<2x128x512xbf16, #tpu.memory_space<vmem>>, %arg8: memref<2x256x128xbf16, #tpu.memory_space<vmem>>, %arg9: memref<2x128xf32, #tpu.memory_space<vmem>>) attributes {dimension_semantics = [], scalar_prefetch = 0 : i64, scratch_operands = 0 : i64, tpu.core_type = #tpu.core_type<tc>} {
    %c0 = arith.constant 0 : index
    %c0_0 = arith.constant 0 : index
    %0 = vector.load %arg0[%c0, %c0_0] : memref<16x128xf32, #tpu.memory_space<vmem>>, vector<16x128xf32>
    %c0_1 = arith.constant 0 : index
    %c0_2 = arith.constant 0 : index
    %1 = vector.load %arg3[%c0_1, %c0_2] : memref<16x128xf32, #tpu.memory_space<vmem>>, vector<16x128xf32>
    %c0_3 = arith.constant 0 : index
    %c0_4 = arith.constant 0 : index
    %2 = vector.load %arg4[%c0_3, %c0_4] : memref<16x128xf32, #tpu.memory_space<vmem>>, vector<16x128xf32>
    %c0_5 = arith.constant 0 : index
    %c0_6 = arith.constant 0 : index
    %3 = vector.load %arg1[%c0_5, %c0_6] : memref<16x16xf32, #tpu.memory_space<vmem>>, vector<16x16xf32>
    %c0_7 = arith.constant 0 : index
    %c0_8 = arith.constant 0 : index
    %4 = vector.load %arg2[%c0_7, %c0_8] : memref<2x16xf32, #tpu.memory_space<vmem>>, vector<2x16xf32>
    %5 = arith.mulf %0, %0 : vector<16x128xf32>
    %cst = arith.constant dense<0.000000e+00> : vector<16xf32>
    %6 = vector.multi_reduction <add>, %5, %cst [1] : vector<16x128xf32> to vector<16xf32>
    %7 = vector.shape_cast %6 : vector<16xf32> to vector<16x1xf32>
    %cst_9 = arith.constant 1.280000e+02 : f32
    %8 = vector.broadcast %cst_9 : f32 to vector<16x1xf32>
    %9 = arith.divf %7, %8 : vector<16x1xf32>
    %cst_10 = arith.constant 9.99999997E-7 : f32
    %10 = vector.broadcast %cst_10 : f32 to vector<16x1xf32>
    %11 = arith.addf %9, %10 : vector<16x1xf32>
    %12 = math.rsqrt %11 : vector<16x1xf32>
    %13 = vector.broadcast %12 : vector<16x1xf32> to vector<16x128xf32>
    %14 = arith.mulf %0, %13 : vector<16x128xf32>
    %15 = arith.truncf %14 : vector<16x128xf32> to vector<16x128xbf16>
    %c0_11 = arith.constant 0 : index
    %c0_12 = arith.constant 0 : index
    %c0_13 = arith.constant 0 : index
    %16 = vector.load %arg5[%c0_11, %c0_12, %c0_13] : memref<2x128x384xbf16, #tpu.memory_space<vmem>>, vector<1x128x384xbf16>
    %17 = vector.shape_cast %16 : vector<1x128x384xbf16> to vector<128x384xbf16>
    %cst_14 = arith.constant dense<0.000000e+00> : vector<16x384xf32>
    %18 = tpu.matmul %15, %17, %cst_14 {dimension_numbers = #tpu.dot_dimension_numbers<[1], [0], [0], [1], [0, 0, 1, 1], [], []>} : vector<16x128xbf16>, vector<128x384xbf16>, vector<16x384xf32> -> vector<16x384xf32>
    %19 = vector.extract_strided_slice %18 {offsets = [0, 0], sizes = [16, 128], strides = [1, 1]} : vector<16x384xf32> to vector<16x128xf32>
    %20 = arith.mulf %19, %1 : vector<16x128xf32>
    %c64_i32 = arith.constant 64 : i32
    %21 = tpu.dynamic_rotate %19 by %c64_i32 dim 1 : vector<16x128xf32>, i32 -> vector<16x128xf32>
    %22 = arith.mulf %21, %2 : vector<16x128xf32>
    %23 = arith.addf %20, %22 : vector<16x128xf32>
    %24 = vector.extract_strided_slice %18 {offsets = [0, 128], sizes = [16, 128], strides = [1, 1]} : vector<16x384xf32> to vector<16x128xf32>
    %25 = arith.mulf %24, %1 : vector<16x128xf32>
    %c64_i32_15 = arith.constant 64 : i32
    %26 = tpu.dynamic_rotate %24 by %c64_i32_15 dim 1 : vector<16x128xf32>, i32 -> vector<16x128xf32>
    %27 = arith.mulf %26, %2 : vector<16x128xf32>
    %28 = arith.addf %25, %27 : vector<16x128xf32>
    %29 = arith.truncf %28 : vector<16x128xf32> to vector<16x128xbf16>
    %30 = vector.extract_strided_slice %18 {offsets = [0, 256], sizes = [16, 128], strides = [1, 1]} : vector<16x384xf32> to vector<16x128xf32>
    %31 = arith.truncf %30 : vector<16x128xf32> to vector<16x128xbf16>
    %32 = arith.truncf %23 : vector<16x128xf32> to vector<16x128xbf16>
    %cst_16 = arith.constant dense<0.000000e+00> : vector<16x16xf32>
    %33 = tpu.matmul %32, %29, %cst_16 {dimension_numbers = #tpu.dot_dimension_numbers<[1], [1], [0], [0], [0, 0, 1, 0], [], []>} : vector<16x128xbf16>, vector<16x128xbf16>, vector<16x16xf32> -> vector<16x16xf32>
    %34 = arith.addf %33, %3 : vector<16x16xf32>
    %cst_17 = arith.constant dense<0xFF800000> : vector<16xf32>
    %35 = vector.multi_reduction <maximumf>, %34, %cst_17 [1] : vector<16x16xf32> to vector<16xf32>
    %36 = vector.shape_cast %35 : vector<16xf32> to vector<16x1xf32>
    %37 = vector.broadcast %36 : vector<16x1xf32> to vector<16x16xf32>
    %38 = arith.subf %34, %37 : vector<16x16xf32>
    %39 = math.exp %38 : vector<16x16xf32>
    %cst_18 = arith.constant dense<0.000000e+00> : vector<16xf32>
    %40 = vector.multi_reduction <add>, %39, %cst_18 [1] : vector<16x16xf32> to vector<16xf32>
    %41 = vector.shape_cast %40 : vector<16xf32> to vector<16x1xf32>
    %42 = tpu.reciprocal %41 {approx = true} : vector<16x1xf32> -> vector<16x1xf32>
    %43 = vector.broadcast %42 : vector<16x1xf32> to vector<16x16xf32>
    %44 = arith.mulf %39, %43 : vector<16x16xf32>
    %45 = arith.truncf %44 : vector<16x16xf32> to vector<16x16xbf16>
    %cst_19 = arith.constant dense<0.000000e+00> : vector<16x128xf32>
    %46 = tpu.matmul %45, %31, %cst_19 {dimension_numbers = #tpu.dot_dimension_numbers<[1], [0], [0], [1], [0, 0, 1, 1], [], []>} : vector<16x16xbf16>, vector<16x128xbf16>, vector<16x128xf32> -> vector<16x128xf32>
    %47 = arith.truncf %46 : vector<16x128xf32> to vector<16x128xbf16>
    %c0_20 = arith.constant 0 : index
    %c0_21 = arith.constant 0 : index
    %c0_22 = arith.constant 0 : index
    %48 = vector.load %arg6[%c0_20, %c0_21, %c0_22] : memref<2x128x128xbf16, #tpu.memory_space<vmem>>, vector<1x128x128xbf16>
    %49 = vector.shape_cast %48 : vector<1x128x128xbf16> to vector<128x128xbf16>
    %cst_23 = arith.constant dense<0.000000e+00> : vector<16x128xf32>
    %50 = tpu.matmul %47, %49, %cst_23 {dimension_numbers = #tpu.dot_dimension_numbers<[1], [0], [0], [1], [0, 0, 1, 1], [], []>} : vector<16x128xbf16>, vector<128x128xbf16>, vector<16x128xf32> -> vector<16x128xf32>
    %51 = arith.addf %0, %50 : vector<16x128xf32>
    %52 = arith.mulf %51, %51 : vector<16x128xf32>
    %cst_24 = arith.constant dense<0.000000e+00> : vector<16xf32>
    %53 = vector.multi_reduction <add>, %52, %cst_24 [1] : vector<16x128xf32> to vector<16xf32>
    %54 = vector.shape_cast %53 : vector<16xf32> to vector<16x1xf32>
    %cst_25 = arith.constant 1.280000e+02 : f32
    %55 = vector.broadcast %cst_25 : f32 to vector<16x1xf32>
    %56 = arith.divf %54, %55 : vector<16x1xf32>
    %cst_26 = arith.constant 9.99999997E-7 : f32
    %57 = vector.broadcast %cst_26 : f32 to vector<16x1xf32>
    %58 = arith.addf %56, %57 : vector<16x1xf32>
    %59 = math.rsqrt %58 : vector<16x1xf32>
    %60 = vector.broadcast %59 : vector<16x1xf32> to vector<16x128xf32>
    %61 = arith.mulf %51, %60 : vector<16x128xf32>
    %62 = arith.truncf %61 : vector<16x128xf32> to vector<16x128xbf16>
    %c0_27 = arith.constant 0 : index
    %c0_28 = arith.constant 0 : index
    %c0_29 = arith.constant 0 : index
    %63 = vector.load %arg7[%c0_27, %c0_28, %c0_29] : memref<2x128x512xbf16, #tpu.memory_space<vmem>>, vector<1x128x512xbf16>
    %64 = vector.shape_cast %63 : vector<1x128x512xbf16> to vector<128x512xbf16>
    %cst_30 = arith.constant dense<0.000000e+00> : vector<16x512xf32>
    %65 = tpu.matmul %62, %64, %cst_30 {dimension_numbers = #tpu.dot_dimension_numbers<[1], [0], [0], [1], [0, 0, 1, 1], [], []>} : vector<16x128xbf16>, vector<128x512xbf16>, vector<16x512xf32> -> vector<16x512xf32>
    %66 = vector.extract_strided_slice %65 {offsets = [0, 0], sizes = [16, 256], strides = [1, 1]} : vector<16x512xf32> to vector<16x256xf32>
    %67 = arith.negf %66 : vector<16x256xf32>
    %68 = math.exp %67 : vector<16x256xf32>
    %cst_31 = arith.constant 1.000000e+00 : f32
    %69 = vector.broadcast %cst_31 : f32 to vector<16x256xf32>
    %70 = arith.addf %69, %68 : vector<16x256xf32>
    %71 = arith.divf %69, %70 : vector<16x256xf32>
    %72 = arith.mulf %66, %71 : vector<16x256xf32>
    %73 = vector.extract_strided_slice %65 {offsets = [0, 256], sizes = [16, 256], strides = [1, 1]} : vector<16x512xf32> to vector<16x256xf32>
    %74 = arith.mulf %72, %73 : vector<16x256xf32>
    %75 = arith.truncf %74 : vector<16x256xf32> to vector<16x256xbf16>
    %c0_32 = arith.constant 0 : index
    %c0_33 = arith.constant 0 : index
    %c0_34 = arith.constant 0 : index
    %76 = vector.load %arg8[%c0_32, %c0_33, %c0_34] : memref<2x256x128xbf16, #tpu.memory_space<vmem>>, vector<1x256x128xbf16>
    %77 = vector.shape_cast %76 : vector<1x256x128xbf16> to vector<256x128xbf16>
    %cst_35 = arith.constant dense<0.000000e+00> : vector<16x128xf32>
    %78 = tpu.matmul %75, %77, %cst_35 {dimension_numbers = #tpu.dot_dimension_numbers<[1], [0], [0], [1], [0, 0, 1, 1], [], []>} : vector<16x256xbf16>, vector<256x128xbf16>, vector<16x128xf32> -> vector<16x128xf32>
    %79 = arith.addf %51, %78 : vector<16x128xf32>
    %80 = arith.mulf %79, %79 : vector<16x128xf32>
    %cst_36 = arith.constant dense<0.000000e+00> : vector<16xf32>
    %81 = vector.multi_reduction <add>, %80, %cst_36 [1] : vector<16x128xf32> to vector<16xf32>
    %82 = vector.shape_cast %81 : vector<16xf32> to vector<16x1xf32>
    %cst_37 = arith.constant 1.280000e+02 : f32
    %83 = vector.broadcast %cst_37 : f32 to vector<16x1xf32>
    %84 = arith.divf %82, %83 : vector<16x1xf32>
    %cst_38 = arith.constant 9.99999997E-7 : f32
    %85 = vector.broadcast %cst_38 : f32 to vector<16x1xf32>
    %86 = arith.addf %84, %85 : vector<16x1xf32>
    %87 = math.rsqrt %86 : vector<16x1xf32>
    %88 = vector.broadcast %87 : vector<16x1xf32> to vector<16x128xf32>
    %89 = arith.mulf %79, %88 : vector<16x128xf32>
    %90 = arith.truncf %89 : vector<16x128xf32> to vector<16x128xbf16>
    %c1 = arith.constant 1 : index
    %c0_39 = arith.constant 0 : index
    %c0_40 = arith.constant 0 : index
    %91 = vector.load %arg5[%c1, %c0_39, %c0_40] : memref<2x128x384xbf16, #tpu.memory_space<vmem>>, vector<1x128x384xbf16>
    %92 = vector.shape_cast %91 : vector<1x128x384xbf16> to vector<128x384xbf16>
    %cst_41 = arith.constant dense<0.000000e+00> : vector<16x384xf32>
    %93 = tpu.matmul %90, %92, %cst_41 {dimension_numbers = #tpu.dot_dimension_numbers<[1], [0], [0], [1], [0, 0, 1, 1], [], []>} : vector<16x128xbf16>, vector<128x384xbf16>, vector<16x384xf32> -> vector<16x384xf32>
    %94 = vector.extract_strided_slice %93 {offsets = [0, 0], sizes = [16, 128], strides = [1, 1]} : vector<16x384xf32> to vector<16x128xf32>
    %95 = arith.mulf %94, %1 : vector<16x128xf32>
    %c64_i32_42 = arith.constant 64 : i32
    %96 = tpu.dynamic_rotate %94 by %c64_i32_42 dim 1 : vector<16x128xf32>, i32 -> vector<16x128xf32>
    %97 = arith.mulf %96, %2 : vector<16x128xf32>
    %98 = arith.addf %95, %97 : vector<16x128xf32>
    %99 = vector.extract_strided_slice %93 {offsets = [0, 128], sizes = [16, 128], strides = [1, 1]} : vector<16x384xf32> to vector<16x128xf32>
    %100 = arith.mulf %99, %1 : vector<16x128xf32>
    %c64_i32_43 = arith.constant 64 : i32
    %101 = tpu.dynamic_rotate %99 by %c64_i32_43 dim 1 : vector<16x128xf32>, i32 -> vector<16x128xf32>
    %102 = arith.mulf %101, %2 : vector<16x128xf32>
    %103 = arith.addf %100, %102 : vector<16x128xf32>
    %104 = arith.truncf %103 : vector<16x128xf32> to vector<16x128xbf16>
    %105 = vector.extract_strided_slice %93 {offsets = [0, 256], sizes = [16, 128], strides = [1, 1]} : vector<16x384xf32> to vector<16x128xf32>
    %106 = arith.truncf %105 : vector<16x128xf32> to vector<16x128xbf16>
    %107 = vector.shape_cast %98 : vector<16x128xf32> to vector<2x8x128xf32>
    %108 = vector.extract_strided_slice %107 {offsets = [0, 7, 0], sizes = [2, 1, 128], strides = [1, 1, 1]} : vector<2x8x128xf32> to vector<2x1x128xf32>
    %109 = vector.shape_cast %108 : vector<2x1x128xf32> to vector<2x128xf32>
    %110 = arith.truncf %109 : vector<2x128xf32> to vector<2x128xbf16>
    %111 = vector.shape_cast %79 : vector<16x128xf32> to vector<2x8x128xf32>
    %112 = vector.extract_strided_slice %111 {offsets = [0, 7, 0], sizes = [2, 1, 128], strides = [1, 1, 1]} : vector<2x8x128xf32> to vector<2x1x128xf32>
    %113 = vector.shape_cast %112 : vector<2x1x128xf32> to vector<2x128xf32>
    %cst_44 = arith.constant dense<0.000000e+00> : vector<2x16xf32>
    %114 = tpu.matmul %110, %104, %cst_44 {dimension_numbers = #tpu.dot_dimension_numbers<[1], [1], [0], [0], [0, 0, 1, 0], [], []>} : vector<2x128xbf16>, vector<16x128xbf16>, vector<2x16xf32> -> vector<2x16xf32>
    %115 = arith.addf %114, %4 : vector<2x16xf32>
    %cst_45 = arith.constant dense<0xFF800000> : vector<2xf32>
    %116 = vector.multi_reduction <maximumf>, %115, %cst_45 [1] : vector<2x16xf32> to vector<2xf32>
    %117 = vector.shape_cast %116 : vector<2xf32> to vector<2x1xf32>
    %118 = vector.broadcast %117 : vector<2x1xf32> to vector<2x16xf32>
    %119 = arith.subf %115, %118 : vector<2x16xf32>
    %120 = math.exp %119 : vector<2x16xf32>
    %cst_46 = arith.constant dense<0.000000e+00> : vector<2xf32>
    %121 = vector.multi_reduction <add>, %120, %cst_46 [1] : vector<2x16xf32> to vector<2xf32>
    %122 = vector.shape_cast %121 : vector<2xf32> to vector<2x1xf32>
    %123 = tpu.reciprocal %122 {approx = true} : vector<2x1xf32> -> vector<2x1xf32>
    %124 = vector.broadcast %123 : vector<2x1xf32> to vector<2x16xf32>
    %125 = arith.mulf %120, %124 : vector<2x16xf32>
    %126 = arith.truncf %125 : vector<2x16xf32> to vector<2x16xbf16>
    %cst_47 = arith.constant dense<0.000000e+00> : vector<2x128xf32>
    %127 = tpu.matmul %126, %106, %cst_47 {dimension_numbers = #tpu.dot_dimension_numbers<[1], [0], [0], [1], [0, 0, 1, 1], [], []>} : vector<2x16xbf16>, vector<16x128xbf16>, vector<2x128xf32> -> vector<2x128xf32>
    %128 = arith.truncf %127 : vector<2x128xf32> to vector<2x128xbf16>
    %c1_48 = arith.constant 1 : index
    %c0_49 = arith.constant 0 : index
    %c0_50 = arith.constant 0 : index
    %129 = vector.load %arg6[%c1_48, %c0_49, %c0_50] : memref<2x128x128xbf16, #tpu.memory_space<vmem>>, vector<1x128x128xbf16>
    %130 = vector.shape_cast %129 : vector<1x128x128xbf16> to vector<128x128xbf16>
    %cst_51 = arith.constant dense<0.000000e+00> : vector<2x128xf32>
    %131 = tpu.matmul %128, %130, %cst_51 {dimension_numbers = #tpu.dot_dimension_numbers<[1], [0], [0], [1], [0, 0, 1, 1], [], []>} : vector<2x128xbf16>, vector<128x128xbf16>, vector<2x128xf32> -> vector<2x128xf32>
    %132 = arith.addf %113, %131 : vector<2x128xf32>
    %133 = arith.mulf %132, %132 : vector<2x128xf32>
    %cst_52 = arith.constant dense<0.000000e+00> : vector<2xf32>
    %134 = vector.multi_reduction <add>, %133, %cst_52 [1] : vector<2x128xf32> to vector<2xf32>
    %135 = vector.shape_cast %134 : vector<2xf32> to vector<2x1xf32>
    %cst_53 = arith.constant 1.280000e+02 : f32
    %136 = vector.broadcast %cst_53 : f32 to vector<2x1xf32>
    %137 = arith.divf %135, %136 : vector<2x1xf32>
    %cst_54 = arith.constant 9.99999997E-7 : f32
    %138 = vector.broadcast %cst_54 : f32 to vector<2x1xf32>
    %139 = arith.addf %137, %138 : vector<2x1xf32>
    %140 = math.rsqrt %139 : vector<2x1xf32>
    %141 = vector.broadcast %140 : vector<2x1xf32> to vector<2x128xf32>
    %142 = arith.mulf %132, %141 : vector<2x128xf32>
    %143 = arith.truncf %142 : vector<2x128xf32> to vector<2x128xbf16>
    %c1_55 = arith.constant 1 : index
    %c0_56 = arith.constant 0 : index
    %c0_57 = arith.constant 0 : index
    %144 = vector.load %arg7[%c1_55, %c0_56, %c0_57] : memref<2x128x512xbf16, #tpu.memory_space<vmem>>, vector<1x128x512xbf16>
    %145 = vector.shape_cast %144 : vector<1x128x512xbf16> to vector<128x512xbf16>
    %cst_58 = arith.constant dense<0.000000e+00> : vector<2x512xf32>
    %146 = tpu.matmul %143, %145, %cst_58 {dimension_numbers = #tpu.dot_dimension_numbers<[1], [0], [0], [1], [0, 0, 1, 1], [], []>} : vector<2x128xbf16>, vector<128x512xbf16>, vector<2x512xf32> -> vector<2x512xf32>
    %147 = vector.extract_strided_slice %146 {offsets = [0, 0], sizes = [2, 256], strides = [1, 1]} : vector<2x512xf32> to vector<2x256xf32>
    %148 = arith.negf %147 : vector<2x256xf32>
    %149 = math.exp %148 : vector<2x256xf32>
    %cst_59 = arith.constant 1.000000e+00 : f32
    %150 = vector.broadcast %cst_59 : f32 to vector<2x256xf32>
    %151 = arith.addf %150, %149 : vector<2x256xf32>
    %152 = arith.divf %150, %151 : vector<2x256xf32>
    %153 = arith.mulf %147, %152 : vector<2x256xf32>
    %154 = vector.extract_strided_slice %146 {offsets = [0, 256], sizes = [2, 256], strides = [1, 1]} : vector<2x512xf32> to vector<2x256xf32>
    %155 = arith.mulf %153, %154 : vector<2x256xf32>
    %156 = arith.truncf %155 : vector<2x256xf32> to vector<2x256xbf16>
    %c1_60 = arith.constant 1 : index
    %c0_61 = arith.constant 0 : index
    %c0_62 = arith.constant 0 : index
    %157 = vector.load %arg8[%c1_60, %c0_61, %c0_62] : memref<2x256x128xbf16, #tpu.memory_space<vmem>>, vector<1x256x128xbf16>
    %158 = vector.shape_cast %157 : vector<1x256x128xbf16> to vector<256x128xbf16>
    %cst_63 = arith.constant dense<0.000000e+00> : vector<2x128xf32>
    %159 = tpu.matmul %156, %158, %cst_63 {dimension_numbers = #tpu.dot_dimension_numbers<[1], [0], [0], [1], [0, 0, 1, 1], [], []>} : vector<2x256xbf16>, vector<256x128xbf16>, vector<2x128xf32> -> vector<2x128xf32>
    %160 = arith.addf %132, %159 : vector<2x128xf32>
    %c0_64 = arith.constant 0 : index
    %c0_65 = arith.constant 0 : index
    %161 = vector.load %arg9[%c0_64, %c0_65] : memref<2x128xf32, #tpu.memory_space<vmem>>, vector<2x128xf32>
    tpu.vector_store %arg9[%c0_64, %c0_65], %160 {strides = array<i32>} : memref<2x128xf32, #tpu.memory_space<vmem>>, vector<2x128xf32>,
    return
  }
}

</mosaic_0001>

<bundles_post_ra>
// kernel: tpu_custom_call.1
= control target key start
LH: loop header
LB: loop body
LE: loop exit
PB: predicated region body
PF: predicated region fallthrough
CT: control target
= control target key end

     0   :  { %14 = vsyncpa [#allocation3], 0  ;;  %s3389_s0 = inlined_call_operand.hbm [shape: f32[16,128], index: 0, kind: input, shape index: {}]   ;;  %s3390_s1 = inlined_call_operand.hbm [shape: f32[16,16], index: 1, kind: input, shape index: {}]   ;;  %s3391_s2 = inlined_call_operand.vmem [shape: f32[2,16], index: 2, kind: input, shape index: {}]   ;;  %s3392_s3 = inlined_call_operand.hbm [shape: f32[16,128], index: 3, kind: input, shape index: {}]   ;;  %s3393_s4 = inlined_call_operand.hbm [shape: f32[16,128], index: 4, kind: input, shape index: {}]   ;;  %s3394_s5 = inlined_call_operand.hbm [shape: bf16[2,128,384], index: 5, kind: input, shape index: {}]   ;;  %s3395_s6 = inlined_call_operand.hbm [shape: bf16[2,128,128], index: 6, kind: input, shape index: {}]   ;;  %s3396_s7 = inlined_call_operand.hbm [shape: bf16[2,128,512], index: 7, kind: input, shape index: {}]   ;;  %s3397_s8 = inlined_call_operand.hbm [shape: bf16[2,256,128], index: 8, kind: input, shape index: {}]   ;;  %s3398_s9 = inlined_call_operand.hbm [shape: f32[2,128], index: 9, kind: output, shape index: {}]  }
   0x1   :  { %15 = vsyncpa [#allocation6], 0 }
   0x2   :  { %16 = vsyncpa [#allocation9], 0 }
   0x3   :  { %17 = vsyncpa [#allocation12], 0 }
   0x4   :  { %18 = vsyncpa [#allocation15], 0 }
   0x5   :  { %19 = vsyncpa [#allocation4], 0  ;;  %s3037_s30 = smov [#allocation5]   ;;  %s3038_s11 = smov [#allocation8]  }
   0x6   :  { %s37_s10 = sshll.u32 %s3037_s30, 4  ;;  %s63_s12 = sshll.u32 %s3038_s11, 4  ;;  %s38_s10 = int_to_ptr.vmem [resolvable:$true] %s37_s10  ;;  %s3107_s12 = int_to_ptr.vmem [resolvable:$true] %s63_s12 }
   0x7   :  { %s2827_s15 = scalar_lea.hbm %s3390_s1, 256 }
   0x8   :  { %p2828_p0 = scmp.ne.s32.totalorder %s3390_s1, %s2827_s15  ;;  %p2831_p1 = scmp.lt.u32.totalorder %s2827_s15, %s3390_s1 }
   0xa   :  { %p2833_p2 = pnand %p2831_p1, %p2828_p0 }
   0xc   :  { %2836 = shalt.err (!%p2833_p2)
}
   0xd   :  { %s2837_s20 = scalar_lea.vmem %s38_s10, 256  ;;  %p2842_p4 = scmp.lt.s32.totalorder %s38_s10, %s38_s10 }
   0xe   :  { %p2838_p3 = scmp.ne.s32.totalorder %s38_s10, %s2837_s20  ;;  %p2843_p5 = scmp.lt.s32.totalorder %s2837_s20, %s2837_s20 }
  0x10   :  { %p2844_p6 = por %p2843_p5, %p2842_p4 }
  0x12   :  { %p2845_p7 = pnand %p2844_p6, %p2838_p3 }
  0x14   :  { %2848 = shalt.err (!%p2845_p7)
}
  0x15   :  { %s3039_s21 = smov 128   ;;  %s3040_s22 = smov 8  }
  0x16   :  { %43 = dma.hbm_to_vmem [thread:$0]  %s3390_s1, 256, %s38_s10, [#allocation6], %s3039_s21, %s3039_s21, %s3040_s22  }
  0x17   :  { %s2849_s27 = scalar_lea.hbm %s3393_s4, 256 }
  0x18   :  { %p2850_p8 = scmp.ne.s32.totalorder %s3393_s4, %s2849_s27  ;;  %p2853_p9 = scmp.lt.u32.totalorder %s2849_s27, %s3393_s4 }
  0x1a   :  { %p2855_p10 = pnand %p2853_p9, %p2850_p8 }
  0x1c   :  { %2858 = shalt.err (!%p2855_p10)
}
  0x1d   :  { %s2859_s13 = scalar_lea.vmem %s3107_s12, 256  ;;  %p2864_p12 = scmp.lt.s32.totalorder %s3107_s12, %s3107_s12 }
  0x1e   :  { %p2860_p11 = scmp.ne.s32.totalorder %s3107_s12, %s2859_s13  ;;  %p2865_p13 = scmp.lt.s32.totalorder %s2859_s13, %s2859_s13 }
  0x20   :  { %p2866_p0 = por %p2865_p13, %p2864_p12 }
  0x22   :  { %p2867_p1 = pnand %p2866_p0, %p2860_p11 }
  0x24   :  { %2870 = shalt.err (!%p2867_p1)
}
  0x25   :  { %69 = dma.hbm_to_vmem [thread:$0]  %s3393_s4, 256, %s3107_s12, [#allocation9], %s3039_s21, %s3039_s21, %s3040_s22  }
  0x26   :  { %s3041_s14 = smov [#allocation11]   ;;  %s2871_s18 = scalar_lea.hbm %s3395_s6, 2048 }
  0x27   :  { %s87_s15 = sshll.u32 %s3041_s14, 4  ;;  %p2872_p2 = scmp.ne.s32.totalorder %s3395_s6, %s2871_s18  ;;  %s88_s15 = int_to_ptr.vmem [resolvable:$true] %s87_s15 }
  0x28   :  { %p2875_p3 = scmp.lt.u32.totalorder %s2871_s18, %s3395_s6 }
  0x2a   :  { %p2877_p4 = pnand %p2875_p3, %p2872_p2 }
  0x2c   :  { %2880 = shalt.err (!%p2877_p4)
}
  0x2d   :  { %s2881_s25 = scalar_lea.vmem %s88_s15, 2048  ;;  %p2886_p6 = scmp.lt.s32.totalorder %s88_s15, %s88_s15 }
  0x2e   :  { %p2882_p5 = scmp.ne.s32.totalorder %s88_s15, %s2881_s25  ;;  %p2887_p7 = scmp.lt.s32.totalorder %s2881_s25, %s2881_s25 }
  0x30   :  { %p2888_p8 = por %p2887_p7, %p2886_p6 }
  0x32   :  { %p2889_p9 = pnand %p2888_p8, %p2882_p5 }
  0x34   :  { %2892 = shalt.err (!%p2889_p9)
}
  0x35   :  { %s3042_s4 = smov 64   ;;  %s3043_s12 = smov 4  }
  0x36   :  { %93 = dma.hbm_to_vmem [thread:$0]  %s3395_s6, 2048, %s88_s15, [#allocation12], %s3042_s4, %s3042_s4, %s3043_s12  }
  0x37   :  { %s3044_s28 = smov [#allocation2]   ;;  %s3045_s30 = smov [#allocation7]  }
  0x38   :  { %s25_s29 = sshll.u32 %s3044_s28, 4  ;;  %s51_s11 = sshll.u32 %s3045_s30, 4  ;;  %s26_s29 = int_to_ptr.vmem [resolvable:$true] %s25_s29  ;;  %s52_s11 = int_to_ptr.vmem [resolvable:$true] %s51_s11 }
  0x39   :  { %s2893_s10 = scalar_lea.hbm %s3389_s0, 256 }
  0x3a   :  { %p2894_p10 = scmp.ne.s32.totalorder %s3389_s0, %s2893_s10  ;;  %p2897_p11 = scmp.lt.u32.totalorder %s2893_s10, %s3389_s0 }
  0x3c   :  { %p2899_p12 = pnand %p2897_p11, %p2894_p10 }
  0x3e   :  { %2902 = shalt.err (!%p2899_p12)
}
  0x3f   :  { %s2903_s6 = scalar_lea.vmem %s26_s29, 256  ;;  %p2908_p0 = scmp.lt.s32.totalorder %s26_s29, %s26_s29 }
  0x40   :  { %p2904_p13 = scmp.ne.s32.totalorder %s26_s29, %s2903_s6  ;;  %p2909_p1 = scmp.lt.s32.totalorder %s2903_s6, %s2903_s6 }
  0x42   :  { %p2910_p2 = por %p2909_p1, %p2908_p0 }
  0x44   :  { %p2911_p3 = pnand %p2910_p2, %p2904_p13 }
  0x46   :  { %2914 = shalt.err (!%p2911_p3)
}
  0x47   :  { %31 = dma.hbm_to_vmem [thread:$0]  %s3389_s0, 256, %s26_s29, [#allocation3], %s3039_s21, %s3039_s21, %s3040_s22  }
  0x48   :  { %s2915_s24 = scalar_lea.hbm %s3392_s3, 256 }
  0x49   :  { %p2916_p4 = scmp.ne.s32.totalorder %s3392_s3, %s2915_s24  ;;  %p2919_p5 = scmp.lt.u32.totalorder %s2915_s24, %s3392_s3 }
  0x4b   :  { %p2921_p6 = pnand %p2919_p5, %p2916_p4 }
  0x4d   :  { %2924 = shalt.err (!%p2921_p6)
}
  0x4e   :  { %s2925_s30 = scalar_lea.vmem %s52_s11, 256  ;;  %p2930_p8 = scmp.lt.s32.totalorder %s52_s11, %s52_s11 }
  0x4f   :  { %p2926_p7 = scmp.ne.s32.totalorder %s52_s11, %s2925_s30  ;;  %p2931_p9 = scmp.lt.s32.totalorder %s2925_s30, %s2925_s30 }
  0x51   :  { %p2932_p10 = por %p2931_p9, %p2930_p8 }
  0x53   :  { %p2933_p11 = pnand %p2932_p10, %p2926_p7 }
  0x55   :  { %2936 = shalt.err (!%p2933_p11)
}
  0x56   :  { %57 = dma.hbm_to_vmem [thread:$0]  %s3392_s3, 256, %s52_s11, [#allocation6], %s3039_s21, %s3039_s21, %s3040_s22  }
  0x57   :  { %s3046_s13 = smov [#allocation10]   ;;  %s2937_s16 = scalar_lea.hbm %s3394_s5, 6144 }
  0x58   :  { %s75_s1 = sshll.u32 %s3046_s13, 4  ;;  %p2938_p12 = scmp.ne.s32.totalorder %s3394_s5, %s2937_s16  ;;  %s76_s1 = int_to_ptr.vmem [resolvable:$true] %s75_s1 }
  0x59   :  { %p2941_p13 = scmp.lt.u32.totalorder %s2937_s16, %s3394_s5 }
  0x5b   :  { %p2943_p0 = pnand %p2941_p13, %p2938_p12 }
  0x5d   :  { %2946 = shalt.err (!%p2943_p0)
}
  0x5e   :  { %s2947_s19 = scalar_lea.vmem %s76_s1, 6144  ;;  %p2952_p2 = scmp.lt.s32.totalorder %s76_s1, %s76_s1 }
  0x5f   :  { %p2948_p1 = scmp.ne.s32.totalorder %s76_s1, %s2947_s19  ;;  %p2953_p3 = scmp.lt.s32.totalorder %s2947_s19, %s2947_s19 }
  0x61   :  { %p2954_p4 = por %p2953_p3, %p2952_p2 }
  0x63   :  { %p2955_p5 = pnand %p2954_p4, %p2948_p1 }
  0x65   :  { %2958 = shalt.err (!%p2955_p5)
}
  0x66   :  { %s3047_s3 = smov 192   ;;  %s3048_s21 = smov 12  }
  0x67   :  { %81 = dma.hbm_to_vmem [thread:$0]  %s3394_s5, 6144, %s76_s1, [#allocation9], %s3047_s3, %s3047_s3, %s3048_s21  }
  0x68   :  { %s3049_s20 = smov [#allocation13]   ;;  %s2959_s26 = scalar_lea.hbm %s3396_s7, 8192 }
  0x69   :  { %s99_s23 = sshll.u32 %s3049_s20, 4  ;;  %p2960_p6 = scmp.ne.s32.totalorder %s3396_s7, %s2959_s26  ;;  %s100_s23 = int_to_ptr.vmem [resolvable:$true] %s99_s23 }
  0x6a   :  { %p2963_p7 = scmp.lt.u32.totalorder %s2959_s26, %s3396_s7 }
  0x6c   :  { %p2965_p8 = pnand %p2963_p7, %p2960_p6 }
  0x6e   :  { %2968 = shalt.err (!%p2965_p8)
}
  0x6f   :  { %s2969_s29 = scalar_lea.vmem %s100_s23, 8192  ;;  %p2974_p10 = scmp.lt.s32.totalorder %s100_s23, %s100_s23 }
  0x70   :  { %p2970_p9 = scmp.ne.s32.totalorder %s100_s23, %s2969_s29  ;;  %p2975_p11 = scmp.lt.s32.totalorder %s2969_s29, %s2969_s29 }
  0x72   :  { %p2976_p12 = por %p2975_p11, %p2974_p10 }
  0x74   :  { %p2977_p13 = pnand %p2976_p12, %p2970_p9 }
  0x76   :  { %2980 = shalt.err (!%p2977_p13)
}
  0x77   :  { %s3050_s5 = smov 256   ;;  %s3051_s13 = smov 16  }
  0x78   :  { %105 = dma.hbm_to_vmem [thread:$0]  %s3396_s7, 8192, %s100_s23, [#allocation12], %s3050_s5, %s3050_s5, %s3051_s13  }
  0x79   :  { %s3052_s14 = smov [#allocation14]   ;;  %s2981_s6 = scalar_lea.hbm %s3397_s8, 4096 }
  0x7a   :  { %s111_s16 = sshll.u32 %s3052_s14, 4  ;;  %p2982_p0 = scmp.ne.s32.totalorder %s3397_s8, %s2981_s6  ;;  %s112_s16 = int_to_ptr.vmem [resolvable:$true] %s111_s16 }
  0x7b   :  { %p2985_p1 = scmp.lt.u32.totalorder %s2981_s6, %s3397_s8 }
  0x7d   :  { %p2987_p2 = pnand %p2985_p1, %p2982_p0 }
  0x7f   :  { %2990 = shalt.err (!%p2987_p2)
}
  0x80   :  { %s2991_s22 = scalar_lea.vmem %s112_s16, 4096  ;;  %p2996_p4 = scmp.lt.s32.totalorder %s112_s16, %s112_s16 }
  0x81   :  { %p2992_p3 = scmp.ne.s32.totalorder %s112_s16, %s2991_s22  ;;  %p2997_p5 = scmp.lt.s32.totalorder %s2991_s22, %s2991_s22 }
  0x83   :  { %p2998_p6 = por %p2997_p5, %p2996_p4 }
  0x85   :  { %p2999_p7 = pnand %p2998_p6, %p2992_p3 }
  0x87   :  { %3002 = shalt.err (!%p2999_p7)
}
  0x88   :  { %117 = dma.hbm_to_vmem [thread:$0]  %s3397_s8, 4096, %s112_s16, [#allocation15], %s3042_s4, %s3042_s4, %s3043_s12  }
  0x89   :  { %3025 = dma.done.wait [#allocation3], 256  }
  0x8a   :  { %3026 = vsyncadd [#allocation3], 4294967040 }
  0x8b   :  { %3027 = dma.done.wait [#allocation6], 512  }
  0x8c   :  { %3028 = vsyncadd [#allocation6], 4294966784 }
  0x8d   :  { %3029 = dma.done.wait [#allocation9], 6400  }
  0x8e   :  { %3030 = vsyncadd [#allocation9], 4294960896 }
  0x8f   :  { %3031 = dma.done.wait [#allocation12], 10240  }
  0x90   :  { %3032 = vsyncadd [#allocation12], 4294957056 }
  0x91   :  { %3033 = dma.done.wait [#allocation15], 4096  }
  0x92   :  { %3034 = vsyncadd [#allocation15], 4294963200  ;;  %v3053_v0 = vmov 0.0   ;;  %v3229_v1 = vld [vmem:[#allocation2] sm:$0xff]  ;;  %v3231_v2 = vld [vmem:[#allocation2 + $0x8] sm:$0xff]  ;;  %v3054_v29 = vmov 0  }
  0x93   :  { %2443 = vmatprep.subr.bf16.mxu1 %v3053_v0  ;;  %v152_v3 = vmul.f32 %v3229_v1, %v3229_v1  ;;  %v2567_v4 = vld [vmem:[#allocation10 + $0x4] ss:$12 sps:$4 sm:$0xff]   ;;  %v2569_v5 = vld [vmem:[#allocation10] ss:$12 sps:$4 sm:$0xff]   ;;  %v2570_v6 = vld [vmem:[#allocation10 + $0x8] ss:$12 sps:$4 sm:$0xff]   ;;  %v153_v7 = vmul.f32 %v3231_v2, %v3231_v2  ;;  %360 = vmatprep.mubr.bf16.mxu0 %v3054_v29 }
  0x94   :  { %328 = vmatprep.subr.bf16.mxu0 %v2567_v4  ;;  %v2571_v8 = vld [vmem:[#allocation10 + $0x1c] ss:$12 sps:$4 sm:$0xff]   ;;  %2444 = vmatpush3.bf16.msra.mxu1 %v2570_v6  ;;  %v2573_v9 = vld [vmem:[#allocation10 + $0x18] ss:$12 sps:$4 sm:$0xff]   ;;  %v2574_v10 = vld [vmem:[#allocation10 + $0x20] ss:$12 sps:$4 sm:$0xff]  }
  0x95   :  { %154 = vadd.xlane.f32.xlu0 %v152_v3  ;;  %329 = vmatpush1.bf16.msra.mxu0 %v2569_v5  ;;  %v2575_v11 = vld [vmem:[#allocation10 + $0x34] ss:$12 sps:$4 sm:$0xff]   ;;  %v2577_v12 = vld [vmem:[#allocation10 + $0x30] ss:$12 sps:$4 sm:$0xff]   ;;  %v2578_v13 = vld [vmem:[#allocation10 + $0x38] ss:$12 sps:$4 sm:$0xff]  }
  0x96   :  { %330 = vmatprep.subr.bf16.mxu0 %v2571_v8  ;;  %2445 = vmatprep.subr.bf16.mxu1 %v3053_v0  ;;  %v2579_v14 = vld [vmem:[#allocation10 + $0x4c] ss:$12 sps:$4 sm:$0xff]   ;;  %v2581_v15 = vld [vmem:[#allocation10 + $0x48] ss:$12 sps:$4 sm:$0xff]   ;;  %v2582_v16 = vld [vmem:[#allocation10 + $0x50] ss:$12 sps:$4 sm:$0xff]  }
  0x97   :  { %v2583_v17 = vld [vmem:[#allocation10 + $0x64] ss:$12 sps:$4 sm:$0xff]   ;;  %v2585_v18 = vld [vmem:[#allocation10 + $0x60] ss:$12 sps:$4 sm:$0xff]   ;;  %v2586_v19 = vld [vmem:[#allocation10 + $0x68] ss:$12 sps:$4 sm:$0xff]  }
  0x98   :  { %2446 = vmatpush3.bf16.msra.mxu1 %v2574_v10  ;;  %v2587_v20 = vld [vmem:[#allocation10 + $0x7c] ss:$12 sps:$4 sm:$0xff]   ;;  %v2589_v21 = vld [vmem:[#allocation10 + $0x78] ss:$12 sps:$4 sm:$0xff]   ;;  %v2590_v22 = vld [vmem:[#allocation10 + $0x80] ss:$12 sps:$4 sm:$0xff]  }
  0x99   :  { %156 = vadd.xlane.f32.xlu0 %v153_v7  ;;  %331 = vmatpush1.bf16.msra.mxu0 %v2573_v9  ;;  %v2591_v23 = vld [vmem:[#allocation10 + $0x94] ss:$12 sps:$4 sm:$0xff]   ;;  %v2593_v24 = vld [vmem:[#allocation10 + $0x90] ss:$12 sps:$4 sm:$0xff]   ;;  %v2594_v25 = vld [vmem:[#allocation10 + $0x98] ss:$12 sps:$4 sm:$0xff]  }
  0x9a   :  { %332 = vmatprep.subr.bf16.mxu0 %v2575_v11  ;;  %2447 = vmatprep.subr.bf16.mxu1 %v3053_v0  ;;  %v2595_v26 = vld [vmem:[#allocation10 + $0xac] ss:$12 sps:$4 sm:$0xff]   ;;  %v2597_v27 = vld [vmem:[#allocation10 + $0xa8] ss:$12 sps:$4 sm:$0xff]   ;;  %v2598_v28 = vld [vmem:[#allocation10 + $0xb0] ss:$12 sps:$4 sm:$0xff]  }
  0x9b   :  { %vm3055_vm0 = vmmov 0   ;;  %v3259_v50 = vld [vmem:[#allocation8] sm:$0xff]  ;;  %v3261_v52 = vld [vmem:[#allocation7] sm:$0xff]  ;;  %v3263_v53 = vld [vmem:[#allocation7 + $0x8] sm:$0xff]  ;;  %vm476_vm1 = vcmask 130048   ;;  %vm1440_vm2 = vcmask 1041409  }
  0x9c   :  { %2448 = vmatpush3.bf16.msra.mxu1 %v2578_v13  ;;  %2459 = vmatprep.mubr.msk.bf16.mxu1 %vm3055_vm0, %v3053_v0  ;;  %v3265_v54 = vld [vmem:[#allocation8 + $0x8] sm:$0xff]  ;;  %v149_v11 = vld [vmem:[#allocation5] sm:$0xff]  ;;  %vm1484_vm3 = vcmask 123904   ;;  %vm1660_vm4 = vcmask 1047559   ;;  %vm1664_vm5 = vcmask 1040384  }
  0x9d   :  { %333 = vmatpush1.bf16.msra.mxu0 %v2577_v12  ;;  %2449 = vmatprep.subr.bf16.mxu1 %v3053_v0  ;;  %v150_v13 = vld [vmem:[#allocation5 + $0x8] sm:$0xff] }
  0x9e   :  { %334 = vmatprep.subr.bf16.mxu0 %v2579_v14 }
  0xa0   :  { %2450 = vmatpush3.bf16.msra.mxu1 %v2582_v16 }
  0xa1   :  { %335 = vmatpush1.bf16.msra.mxu0 %v2581_v15  ;;  %2451 = vmatprep.subr.bf16.mxu1 %v3053_v0 }
  0xa2   :  { %336 = vmatprep.subr.bf16.mxu0 %v2583_v17 }
  0xa4   :  { %2452 = vmatpush3.bf16.msra.mxu1 %v2586_v19 }
  0xa5   :  { %337 = vmatpush1.bf16.msra.mxu0 %v2585_v18  ;;  %2453 = vmatprep.subr.bf16.mxu1 %v3053_v0 }
  0xa6   :  { %338 = vmatprep.subr.bf16.mxu0 %v2587_v20 }
  0xa8   :  { %2454 = vmatpush3.bf16.msra.mxu1 %v2590_v22 }
  0xa9   :  { %339 = vmatpush1.bf16.msra.mxu0 %v2589_v21  ;;  %2455 = vmatprep.subr.bf16.mxu1 %v3053_v0 }
  0xaa   :  { %340 = vmatprep.subr.bf16.mxu0 %v2591_v23 }
  0xac   :  { %2456 = vmatpush3.bf16.msra.mxu1 %v2594_v25 }
  0xad   :  { %341 = vmatpush1.bf16.msra.mxu0 %v2593_v24  ;;  %2457 = vmatprep.subr.bf16.mxu1 %v3053_v0 }
  0xae   :  { %342 = vmatprep.subr.bf16.mxu0 %v2595_v26 }
  0xb0   :  { %2458 = vmatpush3.bf16.msra.mxu1 %v2598_v28 }
  0xb1   :  { %343 = vmatpush1.bf16.msra.mxu0 %v2597_v27  ;;  %2469 = vmatprep.subr.bf16.mxu1 %v3053_v0 }
  0xb2   :  { %2463 = vmatprep.subr.bf16.mxu0 %v3053_v0 }
 0x122   :  { %v155_v30 = vpop.xlane.xlu0 %154 }
 0x123   :  { %v159_v31 = vmul.f32 0.0078125, %v155_v30 }
 0x125   :  { %v161_v32 = vadd.f32 1e-06, %v159_v31 }
 0x126   :  { %v157_v33 = vpop.xlane.xlu0 %156 }
 0x127   :  { %v160_v34 = vmul.f32 0.0078125, %v157_v33  ;;  %2775 = vrsqrt.f32 %v161_v32  ;;  %v2599_v32 = vld [vmem:[#allocation11] sm:$0xff]   ;;  %v2600_v33 = vld [vmem:[#allocation11 + $0x8] sm:$0xff]  }
 0x129   :  { %v162_v35 = vadd.f32 1e-06, %v160_v34  ;;  %v2601_v34 = vld [vmem:[#allocation11 + $0x10] sm:$0xff]  }
 0x12b   :  { %2777 = vrsqrt.f32 %v162_v35  ;;  %v2602_v35 = vld [vmem:[#allocation11 + $0x18] sm:$0xff]  }
 0x131   :  { %v2776_v36 = vpop.eup %2775 }
 0x132   :  { %v165_v38 = vmul.f32 %v2776_v36, %v3229_v1  ;;  %v2603_v36 = vld [vmem:[#allocation11 + $0x20] sm:$0xff]  }
 0x135   :  { %v2778_v37 = vpop.eup %2777 }
 0x136   :  { %v166_v39 = vmul.f32 %v2778_v37, %v3231_v2  ;;  %v2604_v37 = vld [vmem:[#allocation11 + $0x28] sm:$0xff]  }
 0x138   :  { %v167_v40 = vpack.c.bf16 %v166_v39, %v165_v38  ;;  %v2605_v38 = vld [vmem:[#allocation11 + $0x30] sm:$0xff]  }
 0x13a   :  { %361 = vmatmul.mubr.bf16.vlgmr.msra.gmra.mrb[0].mxu0 %v167_v40  ;;  %2460 = vmatmul.mubr.bf16.vlgmr.msra.gmra.mrb[0].mxu1 %v167_v40 }
 0x13b   :  { %2465 = vmatprep.mubr.msk.bf16.mxu0 %vm3055_vm0, %v3053_v0  ;;  %2471 = vmatprep.mubr.msk.bf16.mxu1 %vm3055_vm0, %v3053_v0 }
 0x20d   :  { %v362_v41 = vpop.f32.mrb[0].mxu0  ;;  %v405_v42 = vpop.f32.mrb[0].mxu1 }
 0x20e   :  { %v2461_v43 = vpop.f32.mrb[1].mxu1  ;;  %414 = vrot.lane.b32.xlu0 %v362_v41, %s3042_s4  ;;  %v364_v44 = vpop.f32.mrb[1].mxu0  ;;  %v412_v4 = vmul.f32 %v362_v41, %v3261_v52 }
 0x20f   :  { %v408_v45 = vpop.f32.mrb[2].mxu1  ;;  %424 = vrot.lane.b32.xlu1 %v364_v44, %s3042_s4  ;;  %v366_v46 = vpop.f32.mrb[2].mxu0  ;;  %v422_v58 = vmul.f32 %v364_v44, %v3261_v52 }
 0x210   :  { %v433_v47 = vpack.c.bf16 %v408_v45, %v405_v42  ;;  %v368_v48 = vpop.f32.mrb[3].mxu0  ;;  %v2462_v49 = vpop.f32.mrb[3].mxu1  ;;  %v413_v5 = vmul.f32 %v366_v46, %v3263_v53 }
 0x211   :  { %v423_v59 = vmul.f32 %v368_v48, %v3263_v53 }
 0x212   :  { %2470 = vmatpush3.bf16.msra.mxu1 %v433_v47 }
 0x213   :  { %426 = vrot.lane.b32.xlu1 %v368_v48, %s3042_s4 }
 0x217   :  { %416 = vrot.lane.b32.xlu1 %v366_v46, %s3042_s4  ;;  %v2606_v46 = vld [vmem:[#allocation11 + $0x38] sm:$0xff]  }
 0x280   :  { %v415_v56 = vpop.permute.xlu0 %414 }
 0x281   :  { %v425_v51 = vpop.permute.xlu1 %424  ;;  %v418_v61 = vmul.f32 %v415_v56, %v3259_v50  ;;  %v2607_v56 = vld [vmem:[#allocation13] ss:$16 sps:$4 sm:$0xff]  }
 0x282   :  { %v428_v55 = vmul.f32 %v425_v51, %v3259_v50 }
 0x283   :  { %v420_v8 = vadd.f32 %v418_v61, %v412_v4  ;;  %v2618_v61 = vld [vmem:[#allocation13 + $0x2c] ss:$16 sps:$4 sm:$0xff]  }
 0x284   :  { %v430_v62 = vadd.f32 %v428_v55, %v422_v58  ;;  %v2610_v58 = vld [vmem:[#allocation13 + $0x8] ss:$16 sps:$4 sm:$0xff]   ;;  %v2624_v4 = vld [vmem:[#allocation13 + $0x4c] ss:$16 sps:$4 sm:$0xff]  }
 0x285   :  { %v427_v57 = vpop.permute.xlu1 %426 }
 0x286   :  { %v429_v60 = vmul.f32 %v427_v57, %v3265_v54  ;;  %v2609_v57 = vld [vmem:[#allocation13 + $0x4] ss:$16 sps:$4 sm:$0xff]  }
 0x287   :  { %859 = vmatprep.subr.bf16.mxu1 %v2609_v57  ;;  %v2663_v57 = vld [vmem:[#allocation14 + $0x60] sm:$0xff]  }
 0x288   :  { %v431_v63 = vadd.f32 %v429_v60, %v423_v59  ;;  %v2612_v59 = vld [vmem:[#allocation13 + $0xc] ss:$16 sps:$4 sm:$0xff]   ;;  %v2615_v60 = vld [vmem:[#allocation13 + $0x24] ss:$16 sps:$4 sm:$0xff]  }
 0x289   :  { %v417_v3 = vpop.permute.xlu1 %416 }
 0x28a   :  { %v432_v6 = vpack.c.bf16 %v431_v63, %v430_v62  ;;  %v419_v7 = vmul.f32 %v417_v3, %v3265_v54  ;;  %v2613_v62 = vld [vmem:[#allocation13 + $0x20] ss:$16 sps:$4 sm:$0xff]   ;;  %v2616_v63 = vld [vmem:[#allocation13 + $0x28] ss:$16 sps:$4 sm:$0xff]   ;;  %v2621_v3 = vld [vmem:[#allocation13 + $0x44] ss:$16 sps:$4 sm:$0xff]  }
 0x28c   :  { %v421_v9 = vadd.f32 %v419_v7, %v413_v5  ;;  %2464 = vmatpush3.bf16.xpose.msra.mxu0 %v432_v6  ;;  %v2619_v5 = vld [vmem:[#allocation13 + $0x40] ss:$16 sps:$4 sm:$0xff]   ;;  %v2622_v6 = vld [vmem:[#allocation13 + $0x48] ss:$16 sps:$4 sm:$0xff]  }
 0x28d   :  { %2475 = vmatprep.subr.bf16.mxu0 %v3053_v0 }
 0x28e   :  { %v434_v10 = vpack.c.bf16 %v421_v9, %v420_v8 }
 0x293   :  { %2466 = vmatmul.mubr.bf16.vlgmr.msra.gmra.mrb[4].mxu0 %v434_v10 }
 0x294   :  { %2491 = vmatprep.mubr.msk.bf16.mxu0 %vm3055_vm0, %v3053_v0  ;;  %2476 = vmatpush3.bf16.msra.mxu0 %v2599_v32  ;;  %v2649_v32 = vld [vmem:[#allocation13 + $0xe0] ss:$16 sps:$4 sm:$0xff]  }
 0x295   :  { %2477 = vmatprep.subr.bf16.mxu0 %v3053_v0 }
 0x298   :  { %2478 = vmatpush3.bf16.msra.mxu0 %v2600_v33  ;;  %v2652_v33 = vld [vmem:[#allocation13 + $0xe8] ss:$16 sps:$4 sm:$0xff]  }
 0x299   :  { %2479 = vmatprep.subr.bf16.mxu0 %v3053_v0 }
 0x29c   :  { %2480 = vmatpush3.bf16.msra.mxu0 %v2601_v34 }
 0x29d   :  { %2481 = vmatprep.subr.bf16.mxu0 %v3053_v0 }
 0x2a0   :  { %2482 = vmatpush3.bf16.msra.mxu0 %v2602_v35 }
 0x2a1   :  { %2483 = vmatprep.subr.bf16.mxu0 %v3053_v0 }
 0x2a4   :  { %2484 = vmatpush3.bf16.msra.mxu0 %v2603_v36 }
 0x2a5   :  { %2485 = vmatprep.subr.bf16.mxu0 %v3053_v0 }
 0x2a8   :  { %2486 = vmatpush3.bf16.msra.mxu0 %v2604_v37 }
 0x2a9   :  { %2487 = vmatprep.subr.bf16.mxu0 %v3053_v0 }
 0x2ac   :  { %2488 = vmatpush3.bf16.msra.mxu0 %v2605_v38 }
 0x2ad   :  { %2489 = vmatprep.subr.bf16.mxu0 %v3053_v0 }
 0x2b0   :  { %2490 = vmatpush3.bf16.msra.mxu0 %v2606_v46  ;;  %v2656_v46 = vld [vmem:[#allocation14] sm:$0xff]  }
 0x2b1   :  { %902 = vmatprep.subr.bf16.mxu0 %v2612_v59  ;;  %v2665_v59 = vld [vmem:[#allocation14 + $0x68] sm:$0xff]  }
 0x366   :  { %v469_v12 = vpop.f32.mrb[4].mxu0 }
 0x367   :  { %v470_v14 = vadd.f32 %v469_v12, %v149_v11  ;;  %v2467_v15 = vpop.f32.mrb[5].mxu0 }
 0x368   :  { %v472_v16 = vpop.f32.mrb[6].mxu0  ;;  %v2627_v15 = vld [vmem:[#allocation13 + $0x64] ss:$16 sps:$4 sm:$0xff]  }
 0x369   :  { %v473_v17 = vadd.f32 %v472_v16, %v150_v13  ;;  %v2468_v18 = vpop.f32.mrb[7].mxu0  ;;  %v477_v19 = vsel %vm476_vm1, %v470_v14, -inf  ;;  %v2630_v16 = vld [vmem:[#allocation13 + $0x6c] ss:$16 sps:$4 sm:$0xff]  }
 0x36a   :  { %478 = vmax.xlane.f32.xlu1 %v477_v19  ;;  %v2628_v18 = vld [vmem:[#allocation13 + $0x68] ss:$16 sps:$4 sm:$0xff]   ;;  %v2631_v19 = vld [vmem:[#allocation13 + $0x80] ss:$16 sps:$4 sm:$0xff]  }
 0x36b   :  { %v480_v20 = vsel %vm476_vm1, %v473_v17, -inf }
 0x36c   :  { %481 = vmax.xlane.f32.xlu0 %v480_v20  ;;  %v2634_v20 = vld [vmem:[#allocation13 + $0x88] ss:$16 sps:$4 sm:$0xff]  }
 0x3f7   :  { %v479_v21 = vpop.xlane.xlu1 %478 }
 0x3f8   :  { %v483_v22 = vsub.f32 %v470_v14, %v479_v21  ;;  %v2637_v21 = vld [vmem:[#allocation13 + $0xa0] ss:$16 sps:$4 sm:$0xff]  }
 0x3f9   :  { %v482_v23 = vpop.xlane.xlu0 %481 }
 0x3fa   :  { %v485_v24 = vmul.f32 1.442695, %v483_v22  ;;  %v484_v25 = vsub.f32 %v473_v17, %v482_v23  ;;  %v2625_v17 = vld [vmem:[#allocation13 + $0x60] ss:$16 sps:$4 sm:$0xff]   ;;  %v2639_v22 = vld [vmem:[#allocation13 + $0xa4] ss:$16 sps:$4 sm:$0xff]  }
 0x3fb   :  { %v2640_v23 = vld [vmem:[#allocation13 + $0xa8] ss:$16 sps:$4 sm:$0xff]  }
 0x3fc   :  { %2779 = vpow2.f32 %v485_v24  ;;  %v487_v26 = vmul.f32 1.442695, %v484_v25  ;;  %v2642_v24 = vld [vmem:[#allocation13 + $0xac] ss:$16 sps:$4 sm:$0xff]   ;;  %v2645_v25 = vld [vmem:[#allocation13 + $0xc4] ss:$16 sps:$4 sm:$0xff]  }
 0x3fe   :  { %2781 = vpow2.f32 %v487_v26  ;;  %v2648_v26 = vld [vmem:[#allocation13 + $0xcc] ss:$16 sps:$4 sm:$0xff]  }
 0x406   :  { %v2780_v27 = vpop.eup %2779 }
 0x407   :  { %v489_v28 = vsel %vm476_vm1, %v2780_v27, 0.0 }
 0x408   :  { %v2782_v30 = vpop.eup %2781  ;;  %490 = vadd.xlane.f32.xlu1 %v489_v28  ;;  %v2646_v28 = vld [vmem:[#allocation13 + $0xc8] ss:$16 sps:$4 sm:$0xff]  }
 0x409   :  { %v492_v31 = vsel %vm476_vm1, %v2782_v30, 0.0 }
 0x40c   :  { %493 = vadd.xlane.f32.xlu1 %v492_v31  ;;  %v2654_v31 = vld [vmem:[#allocation13 + $0xec] ss:$16 sps:$4 sm:$0xff]  }
 0x495   :  { %v491_v39 = vpop.xlane.xlu1 %490 }
 0x496   :  { %2783 = vrcp.f32 %v491_v39 }
 0x499   :  { %v494_v40 = vpop.xlane.xlu1 %493 }
 0x49a   :  { %2785 = vrcp.f32 %v494_v40 }
 0x4a0   :  { %v2784_v41 = vpop.eup %2783 }
 0x4a1   :  { %v497_v43 = vmul.f32 %v2784_v41, %v2780_v27  ;;  %v2643_v27 = vld [vmem:[#allocation13 + $0xc0] ss:$16 sps:$4 sm:$0xff]  }
 0x4a4   :  { %v2786_v42 = vpop.eup %2785 }
 0x4a5   :  { %v498_v44 = vmul.f32 %v2786_v42, %v2782_v30  ;;  %v2651_v30 = vld [vmem:[#allocation13 + $0xe4] ss:$16 sps:$4 sm:$0xff]  }
 0x4a7   :  { %v499_v45 = vpack.c.bf16 %v498_v44, %v497_v43 }
 0x4a9   :  { %2472 = vmatmul.mubr.msk.bf16.vlgmr.msra.gmra.mrb[4].mxu1 %vm476_vm1, %v499_v45  ;;  %v2655_v45 = vld [vmem:[#allocation14 + $0x40] sm:$0xff]  }
 0x4aa   :  { %891 = vmatprep.mubr.bf16.mxu1 %v3054_v29  ;;  %860 = vmatpush1.bf16.msra.mxu1 %v2607_v56  ;;  %v2662_v56 = vld [vmem:[#allocation14 + $0x18] sm:$0xff]  }
 0x4ab   :  { %861 = vmatprep.subr.bf16.mxu1 %v2615_v60  ;;  %v2666_v60 = vld [vmem:[#allocation14 + $0x28] sm:$0xff]  }
 0x4ae   :  { %862 = vmatpush1.bf16.msra.mxu1 %v2613_v62  ;;  %v2668_v62 = vld [vmem:[#allocation14 + $0x30] sm:$0xff]  }
 0x4af   :  { %863 = vmatprep.subr.bf16.mxu1 %v2621_v3  ;;  %v2670_v3 = vld [vmem:[#allocation14 + $0x38] sm:$0xff]  }
 0x4b2   :  { %864 = vmatpush1.bf16.msra.mxu1 %v2619_v5 }
 0x4b3   :  { %865 = vmatprep.subr.bf16.mxu1 %v2627_v15 }
 0x4b6   :  { %866 = vmatpush1.bf16.msra.mxu1 %v2625_v17 }
 0x57c   :  { %v537_v47 = vpop.f32.mrb[4].mxu1 }
 0x57d   :  { %v2473_v48 = vpop.f32.mrb[5].mxu1 }
 0x57e   :  { %v540_v49 = vpop.f32.mrb[6].mxu1  ;;  %v2658_v48 = vld [vmem:[#allocation14 + $0x8] sm:$0xff]  }
 0x57f   :  { %v544_v51 = vpack.c.bf16 %v540_v49, %v537_v47  ;;  %v2474_v55 = vpop.f32.mrb[7].mxu1  ;;  %v2657_v47 = vld [vmem:[#allocation14 + $0x48] sm:$0xff]   ;;  %v2659_v49 = vld [vmem:[#allocation14 + $0x50] sm:$0xff]  }
 0x580   :  { %v2661_v55 = vld [vmem:[#allocation14 + $0x58] sm:$0xff]  }
 0x581   :  { %2492 = vmatmul.mubr.bf16.vlgmr.msra.gmra.mrb[8].mxu0 %v544_v51  ;;  %v2660_v51 = vld [vmem:[#allocation14 + $0x10] sm:$0xff]  }
 0x582   :  { %934 = vmatprep.mubr.bf16.mxu0 %v3054_v29  ;;  %903 = vmatpush1.bf16.msra.mxu0 %v2610_v58  ;;  %v2664_v58 = vld [vmem:[#allocation14 + $0x20] sm:$0xff]  }
 0x583   :  { %904 = vmatprep.subr.bf16.mxu0 %v2618_v61  ;;  %v2667_v61 = vld [vmem:[#allocation14 + $0x70] sm:$0xff]  }
 0x586   :  { %905 = vmatpush1.bf16.msra.mxu0 %v2616_v63  ;;  %v2669_v63 = vld [vmem:[#allocation14 + $0x78] sm:$0xff]  }
 0x587   :  { %906 = vmatprep.subr.bf16.mxu0 %v2624_v4 }
 0x58a   :  { %907 = vmatpush1.bf16.msra.mxu0 %v2622_v6 }
 0x58b   :  { %908 = vmatprep.subr.bf16.mxu0 %v2630_v16 }
 0x58e   :  { %909 = vmatpush1.bf16.msra.mxu0 %v2628_v18 }
 0x654   :  { %v643_v7 = vpop.f32.mrb[8].mxu0 }
 0x655   :  { %v3293_v8 = vadd.f32 %v643_v7, %v3229_v1  ;;  %v2493_v9 = vpop.f32.mrb[9].mxu0  ;;  %v2633_v1 = vld [vmem:[#allocation13 + $0x84] ss:$16 sps:$4 sm:$0xff]  }
 0x656   :  { %v646_v10 = vpop.f32.mrb[10].mxu0  ;;  %867 = vmatprep.subr.bf16.mxu1 %v2633_v1 }
 0x657   :  { %v3296_v11 = vadd.f32 %v646_v10, %v3231_v2  ;;  %v2494_v12 = vpop.f32.mrb[11].mxu0  ;;  %v652_v13 = vmul.f32 %v3293_v8, %v3293_v8  ;;  %v2636_v2 = vld [vmem:[#allocation13 + $0x8c] ss:$16 sps:$4 sm:$0xff]   ;;  %868 = vmatpush1.bf16.msra.mxu1 %v2631_v19 }
 0x658   :  { %910 = vmatprep.subr.bf16.mxu0 %v2636_v2  ;;  %869 = vmatprep.subr.bf16.mxu1 %v2639_v22 }
 0x659   :  { %654 = vadd.xlane.f32.xlu1 %v652_v13  ;;  %v653_v14 = vmul.f32 %v3296_v11, %v3296_v11  ;;  %911 = vmatpush1.bf16.msra.mxu0 %v2634_v20 }
 0x65a   :  { %912 = vmatprep.subr.bf16.mxu0 %v2642_v24 }
 0x65b   :  { %870 = vmatpush1.bf16.msra.mxu1 %v2637_v21 }
 0x65c   :  { %871 = vmatprep.subr.bf16.mxu1 %v2645_v25 }
 0x65d   :  { %656 = vadd.xlane.f32.xlu1 %v653_v14  ;;  %913 = vmatpush1.bf16.msra.mxu0 %v2640_v23 }
 0x65e   :  { %914 = vmatprep.subr.bf16.mxu0 %v2648_v26 }
 0x65f   :  { %872 = vmatpush1.bf16.msra.mxu1 %v2643_v27 }
 0x660   :  { %873 = vmatprep.subr.bf16.mxu1 %v2651_v30 }
 0x661   :  { %915 = vmatpush1.bf16.msra.mxu0 %v2646_v28 }
 0x662   :  { %916 = vmatprep.subr.bf16.mxu0 %v2654_v31 }
 0x663   :  { %874 = vmatpush1.bf16.msra.mxu1 %v2649_v32 }
 0x664   :  { %2377 = vmatprep.subr.bf16.mxu1 %v2655_v45  ;;  %v2681_v45 = vld [vmem:[#allocation10 + $0xf4] ss:$12 sps:$4 sm:$0xff]  }
 0x665   :  { %917 = vmatpush1.bf16.msra.mxu0 %v2652_v33 }
 0x6e6   :  { %v655_v34 = vpop.xlane.xlu1 %654 }
 0x6e7   :  { %v658_v35 = vmul.f32 0.0078125, %v655_v34 }
 0x6e9   :  { %v660_v36 = vadd.f32 1e-06, %v658_v35 }
 0x6ea   :  { %v657_v37 = vpop.xlane.xlu1 %656 }
 0x6eb   :  { %v659_v38 = vmul.f32 0.0078125, %v657_v37  ;;  %2787 = vrsqrt.f32 %v660_v36 }
 0x6ed   :  { %v661_v39 = vadd.f32 1e-06, %v659_v38 }
 0x6ef   :  { %2789 = vrsqrt.f32 %v661_v39  ;;  %v2671_v39 = vld [vmem:[#allocation10 + $0xc0] ss:$12 sps:$4 sm:$0xff]  }
 0x6f5   :  { %v2788_v40 = vpop.eup %2787 }
 0x6f6   :  { %v664_v42 = vmul.f32 %v2788_v40, %v3293_v8  ;;  %v2673_v40 = vld [vmem:[#allocation10 + $0xc4] ss:$12 sps:$4 sm:$0xff]  }
 0x6f7   :  { %1326 = vmatprep.subr.bf16.mxu0 %v2673_v40 }
 0x6f9   :  { %v2790_v41 = vpop.eup %2789 }
 0x6fa   :  { %v665_v43 = vmul.f32 %v2790_v41, %v3296_v11  ;;  %v2674_v41 = vld [vmem:[#allocation10 + $0xc8] ss:$12 sps:$4 sm:$0xff]  }
 0x6fc   :  { %v666_v44 = vpack.c.bf16 %v665_v43, %v664_v42  ;;  %v2677_v42 = vld [vmem:[#allocation10 + $0xdc] ss:$12 sps:$4 sm:$0xff]   ;;  %v2678_v43 = vld [vmem:[#allocation10 + $0xe0] ss:$12 sps:$4 sm:$0xff]  }
 0x6fe   :  { %892 = vmatmul.mubr.bf16.vlgmr.msra.gmra.mrb[8].mxu1 %v666_v44  ;;  %935 = vmatmul.mubr.bf16.vlgmr.msra.gmra.mrb[12].mxu0 %v666_v44  ;;  %v2675_v44 = vld [vmem:[#allocation10 + $0xd8] ss:$12 sps:$4 sm:$0xff]  }
 0x6ff   :  { %1358 = vmatprep.mubr.bf16.mxu0 %v3054_v29  ;;  %2378 = vmatpush3.bf16.msra.mxu1 %v2656_v46  ;;  %v2682_v46 = vld [vmem:[#allocation10 + $0xf8] ss:$12 sps:$4 sm:$0xff]  }
 0x700   :  { %2379 = vmatprep.subr.bf16.mxu1 %v2657_v47  ;;  %1327 = vmatpush1.bf16.msra.mxu0 %v2671_v39  ;;  %v2679_v47 = vld [vmem:[#allocation10 + $0xf0] ss:$12 sps:$4 sm:$0xff]  }
 0x701   :  { %1328 = vmatprep.subr.bf16.mxu0 %v2677_v42 }
 0x703   :  { %2380 = vmatpush3.bf16.msra.mxu1 %v2658_v48 }
 0x704   :  { %2381 = vmatprep.subr.bf16.mxu1 %v2659_v49  ;;  %1329 = vmatpush1.bf16.msra.mxu0 %v2675_v44 }
 0x705   :  { %1330 = vmatprep.subr.bf16.mxu0 %v2681_v45 }
 0x707   :  { %2382 = vmatpush3.bf16.msra.mxu1 %v2660_v51 }
 0x708   :  { %2383 = vmatprep.subr.bf16.mxu1 %v2661_v55  ;;  %1331 = vmatpush1.bf16.msra.mxu0 %v2679_v47 }
 0x70b   :  { %2384 = vmatpush3.bf16.msra.mxu1 %v2662_v56 }
 0x70c   :  { %2385 = vmatprep.subr.bf16.mxu1 %v2663_v57 }
 0x70f   :  { %2386 = vmatpush3.bf16.msra.mxu1 %v2664_v58 }
 0x710   :  { %2387 = vmatprep.subr.bf16.mxu1 %v2665_v59 }
 0x713   :  { %2388 = vmatpush3.bf16.msra.mxu1 %v2666_v60 }
 0x714   :  { %2389 = vmatprep.subr.bf16.mxu1 %v2667_v61 }
 0x717   :  { %2390 = vmatpush3.bf16.msra.mxu1 %v2668_v62  ;;  %v2685_v62 = vld [vmem:[#allocation10 + $0x10c] ss:$12 sps:$4 sm:$0xff]  }
 0x718   :  { %2391 = vmatprep.subr.bf16.mxu1 %v2669_v63  ;;  %v2683_v63 = vld [vmem:[#allocation10 + $0x108] ss:$12 sps:$4 sm:$0xff]   ;;  %1332 = vmatprep.subr.bf16.mxu0 %v2685_v62 }
 0x719   :  { %1333 = vmatpush1.bf16.msra.mxu0 %v2683_v63 }
 0x71b   :  { %2392 = vmatpush3.bf16.msra.mxu1 %v2670_v3  ;;  %v2686_v3 = vld [vmem:[#allocation10 + $0x110] ss:$12 sps:$4 sm:$0xff]  }
 0x71c   :  { %2495 = vmatprep.subr.bf16.mxu1 %v3053_v0 }
 0x7d1   :  { %v893_v4 = vpop.f32.mrb[8].mxu1  ;;  %v936_v5 = vpop.f32.mrb[12].mxu0 }
 0x7d2   :  { %v2252_v6 = vmul.f32 -1.442695, %v893_v4  ;;  %v895_v7 = vpop.f32.mrb[9].mxu1  ;;  %v938_v9 = vpop.f32.mrb[13].mxu0 }
 0x7d3   :  { %v2253_v10 = vmul.f32 -1.442695, %v895_v7  ;;  %v897_v12 = vpop.f32.mrb[10].mxu1  ;;  %v940_v13 = vpop.f32.mrb[14].mxu0 }
 0x7d4   :  { %2791 = vpow2.f32 %v2252_v6  ;;  %v2254_v14 = vmul.f32 -1.442695, %v897_v12  ;;  %v899_v15 = vpop.f32.mrb[11].mxu1  ;;  %v942_v16 = vpop.f32.mrb[15].mxu0  ;;  %v2693_v6 = vld [vmem:[#allocation10 + $0x13c] ss:$12 sps:$4 sm:$0xff]  }
 0x7d5   :  { %2793 = vpow2.f32 %v2253_v10  ;;  %v2255_v17 = vmul.f32 -1.442695, %v899_v15  ;;  %v2695_v10 = vld [vmem:[#allocation10 + $0x150] ss:$12 sps:$4 sm:$0xff]  }
 0x7d6   :  { %2795 = vpow2.f32 %v2254_v14  ;;  %v2699_v14 = vld [vmem:[#allocation10 + $0x168] ss:$12 sps:$4 sm:$0xff]  }
 0x7d7   :  { %2797 = vpow2.f32 %v2255_v17 }
 0x7de   :  { %v2792_v18 = vpop.eup %2791 }
 0x7df   :  { %v2794_v1 = vpop.eup %2793  ;;  %v957_v2 = vadd.f32 1.0, %v2792_v18 }
 0x7e0   :  { %v2796_v19 = vpop.eup %2795  ;;  %v958_v20 = vadd.f32 1.0, %v2794_v1 }
 0x7e1   :  { %v2798_v21 = vpop.eup %2797  ;;  %2799 = vrcp.f32 %v957_v2  ;;  %v959_v22 = vadd.f32 1.0, %v2796_v19 }
 0x7e2   :  { %2801 = vrcp.f32 %v958_v20  ;;  %v960_v23 = vadd.f32 1.0, %v2798_v21 }
 0x7e3   :  { %2803 = vrcp.f32 %v959_v22 }
 0x7e4   :  { %2805 = vrcp.f32 %v960_v23 }
 0x7eb   :  { %v2800_v24 = vpop.eup %2799 }
 0x7ec   :  { %v2802_v25 = vpop.eup %2801  ;;  %v969_v26 = vmul.f32 %v2800_v24, %v893_v4  ;;  %v2687_v4 = vld [vmem:[#allocation10 + $0x120] ss:$12 sps:$4 sm:$0xff]  }
 0x7ed   :  { %v2804_v27 = vpop.eup %2803  ;;  %v970_v28 = vmul.f32 %v2802_v25, %v895_v7  ;;  %v2694_v7 = vld [vmem:[#allocation10 + $0x140] ss:$12 sps:$4 sm:$0xff]  }
 0x7ee   :  { %v2806_v30 = vpop.eup %2805  ;;  %v973_v31 = vmul.f32 %v969_v26, %v936_v5  ;;  %v971_v32 = vmul.f32 %v2804_v27, %v897_v12  ;;  %v2691_v5 = vld [vmem:[#allocation10 + $0x138] ss:$12 sps:$4 sm:$0xff]  }
 0x7ef   :  { %v974_v33 = vmul.f32 %v970_v28, %v938_v9  ;;  %v972_v34 = vmul.f32 %v2806_v30, %v899_v15  ;;  %v2697_v9 = vld [vmem:[#allocation10 + $0x154] ss:$12 sps:$4 sm:$0xff]   ;;  %v2698_v12 = vld [vmem:[#allocation10 + $0x158] ss:$12 sps:$4 sm:$0xff]   ;;  %v2702_v15 = vld [vmem:[#allocation10 + $0x170] ss:$12 sps:$4 sm:$0xff]  }
 0x7f0   :  { %v975_v35 = vmul.f32 %v971_v32, %v940_v13  ;;  %v2701_v13 = vld [vmem:[#allocation10 + $0x16c] ss:$12 sps:$4 sm:$0xff]  }
 0x7f1   :  { %v976_v36 = vmul.f32 %v972_v34, %v942_v16 }
 0x7f2   :  { %v977_v37 = vpack.c.bf16 %v975_v35, %v973_v31 }
 0x7f3   :  { %v978_v38 = vpack.c.bf16 %v976_v36, %v974_v33 }
 0x7f5   :  { %1139 = vmatprep.mubr.bf16.mxu1 %v978_v38 }
 0x7f6   :  { %1140 = vmatmul.mubr.bf16.vlgmr.msra.gmra.mrb[12].mxu1 %v977_v37 }
 0x7f7   :  { %2511 = vmatprep.mubr.msk.bf16.mxu1 %vm3055_vm0, %v3053_v0  ;;  %2496 = vmatpush3.bf16.msra.mxu1 %v2674_v41 }
 0x7f8   :  { %2497 = vmatprep.subr.bf16.mxu1 %v3053_v0 }
 0x7fb   :  { %2498 = vmatpush3.bf16.msra.mxu1 %v2678_v43 }
 0x7fc   :  { %2499 = vmatprep.subr.bf16.mxu1 %v3053_v0 }
 0x7ff   :  { %2500 = vmatpush3.bf16.msra.mxu1 %v2682_v46 }
 0x800   :  { %2501 = vmatprep.subr.bf16.mxu1 %v3053_v0 }
 0x803   :  { %2502 = vmatpush3.bf16.msra.mxu1 %v2686_v3 }
 0x804   :  { %2503 = vmatprep.subr.bf16.mxu1 %v3053_v0 }
 0x8c9   :  { %v2393_v48 = vpop.f32.mrb[12].mxu1 }
 0x8ca   :  { %v2394_v49 = vpop.f32.mrb[13].mxu1 }
 0x8cb   :  { %v2395_v51 = vadd.f32 %v2394_v49, %v2393_v48  ;;  %v2396_v55 = vpop.f32.mrb[14].mxu1 }
 0x8cc   :  { %v2397_v56 = vpop.f32.mrb[15].mxu1 }
 0x8cd   :  { %v3312_v57 = vadd.f32 %v2395_v51, %v3293_v8  ;;  %v2398_v58 = vadd.f32 %v2397_v56, %v2396_v55  ;;  %v2689_v8 = vld [vmem:[#allocation10 + $0x124] ss:$12 sps:$4 sm:$0xff]  }
 0x8ce   :  { %1334 = vmatprep.subr.bf16.mxu0 %v2689_v8 }
 0x8cf   :  { %v3315_v59 = vadd.f32 %v2398_v58, %v3296_v11  ;;  %v1150_v60 = vmul.f32 %v3312_v57, %v3312_v57  ;;  %v2690_v11 = vld [vmem:[#allocation10 + $0x128] ss:$12 sps:$4 sm:$0xff]   ;;  %1335 = vmatpush1.bf16.msra.mxu0 %v2687_v4 }
 0x8d0   :  { %2504 = vmatpush3.bf16.msra.mxu1 %v2690_v11  ;;  %1336 = vmatprep.subr.bf16.mxu0 %v2693_v6 }
 0x8d1   :  { %1152 = vadd.xlane.f32.xlu0 %v1150_v60  ;;  %v1151_v61 = vmul.f32 %v3315_v59, %v3315_v59  ;;  %2505 = vmatprep.subr.bf16.mxu1 %v3053_v0 }
 0x8d3   :  { %1154 = vadd.xlane.f32.xlu1 %v1151_v61  ;;  %1337 = vmatpush1.bf16.msra.mxu0 %v2691_v5 }
 0x8d4   :  { %2506 = vmatpush3.bf16.msra.mxu1 %v2694_v7  ;;  %1338 = vmatprep.subr.bf16.mxu0 %v2697_v9 }
 0x8d5   :  { %2507 = vmatprep.subr.bf16.mxu1 %v3053_v0 }
 0x8d7   :  { %1339 = vmatpush1.bf16.msra.mxu0 %v2695_v10 }
 0x8d8   :  { %2508 = vmatpush3.bf16.msra.mxu1 %v2698_v12  ;;  %1340 = vmatprep.subr.bf16.mxu0 %v2701_v13  ;;  %v2703_v13 = vld [vmem:[#allocation11 + $0x40] sm:$0xff]  }
 0x8d9   :  { %2509 = vmatprep.subr.bf16.mxu1 %v3053_v0 }
 0x8db   :  { %1341 = vmatpush1.bf16.msra.mxu0 %v2699_v14  ;;  %v2704_v14 = vld [vmem:[#allocation11 + $0x48] sm:$0xff]  }
 0x8dc   :  { %2510 = vmatpush3.bf16.msra.mxu1 %v2702_v15  ;;  %2515 = vmatprep.subr.bf16.mxu0 %v3053_v0  ;;  %v2705_v15 = vld [vmem:[#allocation11 + $0x50] sm:$0xff]  }
 0x8dd   :  { %2521 = vmatprep.subr.bf16.mxu1 %v3053_v0 }
 0x95e   :  { %v1153_v16 = vpop.xlane.xlu0 %1152 }
 0x95f   :  { %v1156_v17 = vmul.f32 0.0078125, %v1153_v16  ;;  %v2706_v16 = vld [vmem:[#allocation11 + $0x58] sm:$0xff]  }
 0x960   :  { %v1155_v18 = vpop.xlane.xlu1 %1154 }
 0x961   :  { %v1158_v1 = vadd.f32 1e-06, %v1156_v17  ;;  %v1157_v2 = vmul.f32 0.0078125, %v1155_v18  ;;  %v2707_v17 = vld [vmem:[#allocation11 + $0x60] sm:$0xff]   ;;  %v2708_v18 = vld [vmem:[#allocation11 + $0x68] sm:$0xff]  }
 0x963   :  { %2807 = vrsqrt.f32 %v1158_v1  ;;  %v1159_v19 = vadd.f32 1e-06, %v1157_v2  ;;  %v2709_v1 = vld [vmem:[#allocation11 + $0x70] sm:$0xff]  }
 0x965   :  { %2809 = vrsqrt.f32 %v1159_v19 }
 0x96d   :  { %v2808_v20 = vpop.eup %2807 }
 0x96e   :  { %v1162_v22 = vmul.f32 %v2808_v20, %v3312_v57 }
 0x96f   :  { %v2810_v21 = vpop.eup %2809 }
 0x970   :  { %v1163_v23 = vmul.f32 %v2810_v21, %v3315_v59 }
 0x972   :  { %v1164_v24 = vpack.c.bf16 %v1163_v23, %v1162_v22  ;;  %v2710_v22 = vld [vmem:[#allocation11 + $0x78] sm:$0xff]  }
 0x974   :  { %1359 = vmatmul.mubr.bf16.vlgmr.msra.gmra.mrb[16].mxu0 %v1164_v24  ;;  %2512 = vmatmul.mubr.bf16.vlgmr.msra.gmra.mrb[16].mxu1 %v1164_v24 }
 0x975   :  { %2517 = vmatprep.mubr.msk.bf16.mxu0 %vm3055_vm0, %v3053_v0  ;;  %2523 = vmatprep.mubr.msk.bf16.mxu1 %vm3055_vm0, %v3053_v0 }
 0xa47   :  { %v1360_v25 = vpop.f32.mrb[16].mxu0  ;;  %v1403_v26 = vpop.f32.mrb[16].mxu1 }
 0xa48   :  { %v2513_v27 = vpop.f32.mrb[17].mxu1  ;;  %1412 = vrot.lane.b32.xlu0 %v1360_v25, %s3042_s4  ;;  %v1362_v28 = vpop.f32.mrb[17].mxu0  ;;  %v1410_v36 = vmul.f32 %v1360_v25, %v3261_v52 }
 0xa49   :  { %v1364_v30 = vpop.f32.mrb[18].mxu0  ;;  %v1406_v31 = vpop.f32.mrb[18].mxu1  ;;  %v1420_v46 = vmul.f32 %v1362_v28, %v3261_v52 }
 0xa4a   :  { %v1431_v32 = vpack.c.bf16 %v1406_v31, %v1403_v26  ;;  %v2514_v33 = vpop.f32.mrb[19].mxu1  ;;  %1414 = vrot.lane.b32.xlu1 %v1364_v30, %s3042_s4  ;;  %v1366_v34 = vpop.f32.mrb[19].mxu0  ;;  %v1411_v39 = vmul.f32 %v1364_v30, %v3263_v53  ;;  %v2714_v30 = vld [vmem:[#allocation13 + $0x108] ss:$16 sps:$4 sm:$0xff]   ;;  %v2716_v31 = vld [vmem:[#allocation13 + $0x10c] ss:$16 sps:$4 sm:$0xff]  }
 0xa4b   :  { %v1421_v48 = vmul.f32 %v1366_v34, %v3263_v53 }
 0xa4c   :  { %2522 = vmatpush3.bf16.msra.mxu1 %v1431_v32  ;;  %1424 = vrot.lane.b32.xlu0 %v1366_v34, %s3042_s4 }
 0xa4e   :  { %1422 = vrot.lane.b32.xlu1 %v1362_v28, %s3042_s4  ;;  %v2713_v28 = vld [vmem:[#allocation13 + $0x104] ss:$16 sps:$4 sm:$0xff]  }
 0xa4f   :  { %1885 = vmatprep.subr.bf16.mxu1 %v2713_v28  ;;  %v2760_v28 = vld [vmem:[#allocation14 + $0x80] sm:$0xff]  }
 0xaba   :  { %v1413_v35 = vpop.permute.xlu0 %1412 }
 0xabb   :  { %v1416_v37 = vmul.f32 %v1413_v35, %v3259_v50 }
 0xabc   :  { %v1415_v38 = vpop.permute.xlu1 %1414 }
 0xabd   :  { %v1418_v40 = vadd.f32 %v1416_v37, %v1410_v36  ;;  %v1417_v41 = vmul.f32 %v1415_v38, %v3265_v54 }
 0xabe   :  { %v1425_v42 = vpop.permute.xlu0 %1424 }
 0xabf   :  { %v1432_v43 = vpack.c.bf16 %v1418_v40, %v1418_v40  ;;  %v1419_v44 = vadd.f32 %v1417_v41, %v1411_v39  ;;  %v1427_v45 = vmul.f32 %v1425_v42, %v3265_v54 }
 0xac0   :  { %v1423_v47 = vpop.permute.xlu1 %1422 }
 0xac1   :  { %v1436_v49 = vunpack.c.l.b16 %v1432_v43  ;;  %v1433_v51 = vpack.c.bf16 %v1419_v44, %v1419_v44  ;;  %v1426_v55 = vmul.f32 %v1423_v47, %v3259_v50  ;;  %v1429_v58 = vadd.f32 %v1427_v45, %v1421_v48  ;;  %v151_v50 = vld [vmem:[%s3391_s2] sm:$0x3]  ;;  %v2719_v44 = vld [vmem:[#allocation13 + $0x124] ss:$16 sps:$4 sm:$0xff]   ;;  %v2728_v47 = vld [vmem:[#allocation13 + $0x14c] ss:$16 sps:$4 sm:$0xff]  }
 0xac2   :  { %v2717_v45 = vld [vmem:[#allocation13 + $0x120] ss:$16 sps:$4 sm:$0xff]   ;;  %s3056_s2 = smov [#allocation16]  }
 0xac3   :  { %v1437_v56 = vunpack.c.l.b16 %v1433_v51  ;;  %v1428_v60 = vadd.f32 %v1426_v55, %v1420_v46  ;;  %v1438_v61 = vrot.slane %v1436_v49, 7  ;;  %v2720_v46 = vld [vmem:[#allocation13 + $0x128] ss:$16 sps:$4 sm:$0xff]   ;;  %v2723_v48 = vld [vmem:[#allocation13 + $0x140] ss:$16 sps:$4 sm:$0xff]   ;;  %s2174_s12 = sshll.u32 %s3056_s2, 4  ;;  %s2175_s12 = int_to_ptr.vmem [resolvable:$true] %s2174_s12 }
 0xac4   :  { %v2726_v49 = vld [vmem:[#allocation13 + $0x148] ss:$16 sps:$4 sm:$0xff]   ;;  %v2731_v51 = vld [vmem:[#allocation13 + $0x164] ss:$16 sps:$4 sm:$0xff]   ;;  %v2734_v55 = vld [vmem:[#allocation13 + $0x16c] ss:$16 sps:$4 sm:$0xff]   ;;  %p3008_p9 = scmp.lt.s32.totalorder %s2175_s12, %s2175_s12 }
 0xac5   :  { %v1439_v62 = vrot.slane %v1437_v56, 6  ;;  %v1430_v63 = vpack.c.bf16 %v1429_v58, %v1428_v60  ;;  %v2729_v56 = vld [vmem:[#allocation13 + $0x160] ss:$16 sps:$4 sm:$0xff]   ;;  %v2732_v58 = vld [vmem:[#allocation13 + $0x168] ss:$16 sps:$4 sm:$0xff]   ;;  %s3003_s20 = scalar_lea.vmem %s2175_s12, 32 }
 0xac6   :  { %v2737_v60 = vld [vmem:[#allocation13 + $0x184] ss:$16 sps:$4 sm:$0xff]   ;;  %p3004_p8 = scmp.ne.s32.totalorder %s2175_s12, %s3003_s20  ;;  %p3009_p10 = scmp.lt.s32.totalorder %s3003_s20, %s3003_s20 }
 0xac7   :  { %2516 = vmatpush3.bf16.xpose.msra.mxu0 %v1430_v63  ;;  %v1441_v3 = vsel %vm1440_vm2, %v1439_v62, %v1438_v61  ;;  %v2740_v61 = vld [vmem:[#allocation13 + $0x18c] ss:$16 sps:$4 sm:$0xff]   ;;  %v2735_v62 = vld [vmem:[#allocation13 + $0x180] ss:$16 sps:$4 sm:$0xff]   ;;  %v2738_v63 = vld [vmem:[#allocation13 + $0x188] ss:$16 sps:$4 sm:$0xff]  }
 0xac8   :  { %2527 = vmatprep.subr.bf16.mxu0 %v3053_v0  ;;  %v1442_v52 = vpack.c.b16 %v1441_v3, %v1441_v3  ;;  %v2743_v3 = vld [vmem:[#allocation13 + $0x1a4] ss:$16 sps:$4 sm:$0xff]   ;;  %p3010_p11 = por %p3009_p10, %p3008_p9 }
 0xaca   :  { %p3011_p12 = pnand %p3010_p11, %p3004_p8 }
 0xace   :  { %2518 = vmatmul.mubr.bf16.vlgmr.msra.gmra.mrb[20].mxu0 %v1442_v52  ;;  %v2746_v52 = vld [vmem:[#allocation13 + $0x1ac] ss:$16 sps:$4 sm:$0xff]  }
 0xacf   :  { %2543 = vmatprep.mubr.msk.bf16.mxu0 %vm3055_vm0, %v3053_v0  ;;  %2528 = vmatpush3.bf16.msra.mxu0 %v2703_v13 }
 0xad0   :  { %2529 = vmatprep.subr.bf16.mxu0 %v3053_v0 }
 0xad3   :  { %2530 = vmatpush3.bf16.msra.mxu0 %v2704_v14 }
 0xad4   :  { %2531 = vmatprep.subr.bf16.mxu0 %v3053_v0 }
 0xad7   :  { %2532 = vmatpush3.bf16.msra.mxu0 %v2705_v15 }
 0xad8   :  { %2533 = vmatprep.subr.bf16.mxu0 %v3053_v0 }
 0xadb   :  { %2534 = vmatpush3.bf16.msra.mxu0 %v2706_v16 }
 0xadc   :  { %2535 = vmatprep.subr.bf16.mxu0 %v3053_v0 }
 0xadf   :  { %2536 = vmatpush3.bf16.msra.mxu0 %v2707_v17 }
 0xae0   :  { %2537 = vmatprep.subr.bf16.mxu0 %v3053_v0 }
 0xae3   :  { %2538 = vmatpush3.bf16.msra.mxu0 %v2708_v18 }
 0xae4   :  { %2539 = vmatprep.subr.bf16.mxu0 %v3053_v0 }
 0xae7   :  { %2540 = vmatpush3.bf16.msra.mxu0 %v2709_v1 }
 0xae8   :  { %2541 = vmatprep.subr.bf16.mxu0 %v3053_v0  ;;  %v2711_v0 = vld [vmem:[#allocation13 + $0x100] ss:$16 sps:$4 sm:$0xff]  }
 0xaeb   :  { %2542 = vmatpush3.bf16.msra.mxu0 %v2710_v22 }
 0xaec   :  { %1926 = vmatprep.subr.bf16.mxu0 %v2716_v31  ;;  %v2762_v31 = vld [vmem:[#allocation14 + $0x88] sm:$0xff]  }
 0xba1   :  { %v1478_v53 = vpop.f32.mrb[20].mxu0 }
 0xba2   :  { %v1479_v54 = vadd.f32 %v1478_v53, %v151_v50  ;;  %v2519_v8 = vpop.f32.mrb[21].mxu0  ;;  %v2741_v50 = vld [vmem:[#allocation13 + $0x1a0] ss:$16 sps:$4 sm:$0xff]   ;;  %v2744_v53 = vld [vmem:[#allocation13 + $0x1a8] ss:$16 sps:$4 sm:$0xff]  }
 0xba3   :  { %v1481_v4 = vpop.f32.mrb[22].mxu0  ;;  %v2752_v8 = vld [vmem:[#allocation13 + $0x1cc] ss:$16 sps:$4 sm:$0xff]  }
 0xba4   :  { %v2520_v11 = vpop.f32.mrb[23].mxu0  ;;  %v1485_v5 = vsel %vm1484_vm3, %v1479_v54, -inf  ;;  %v2747_v4 = vld [vmem:[#allocation13 + $0x1c0] ss:$16 sps:$4 sm:$0xff]  }
 0xba5   :  { %1486 = vmax.xlane.f32.xlu1 %v1485_v5  ;;  %v2750_v11 = vld [vmem:[#allocation13 + $0x1c8] ss:$16 sps:$4 sm:$0xff]   ;;  %v2755_v5 = vld [vmem:[#allocation13 + $0x1e4] ss:$16 sps:$4 sm:$0xff]  }
 0xc32   :  { %v1487_v6 = vpop.xlane.xlu1 %1486 }
 0xc33   :  { %v1488_v7 = vsub.f32 %v1479_v54, %v1487_v6  ;;  %v2749_v54 = vld [vmem:[#allocation13 + $0x1c4] ss:$16 sps:$4 sm:$0xff]   ;;  %v2758_v6 = vld [vmem:[#allocation13 + $0x1ec] ss:$16 sps:$4 sm:$0xff]  }
 0xc35   :  { %v1489_v9 = vmul.f32 1.442695, %v1488_v7  ;;  %v2753_v7 = vld [vmem:[#allocation13 + $0x1e0] ss:$16 sps:$4 sm:$0xff]  }
 0xc37   :  { %2811 = vpow2.f32 %v1489_v9  ;;  %v2756_v9 = vld [vmem:[#allocation13 + $0x1e8] ss:$16 sps:$4 sm:$0xff]  }
 0xc41   :  { %v2812_v10 = vpop.eup %2811 }
 0xc42   :  { %v1491_v12 = vsel %vm1484_vm3, %v2812_v10, 0.0 }
 0xc43   :  { %1492 = vadd.xlane.f32.xlu0 %v1491_v12 }
 0xcd0   :  { %v1493_v2 = vpop.xlane.xlu0 %1492 }
 0xcd1   :  { %2813 = vrcp.f32 %v1493_v2 }
 0xcdb   :  { %v2814_v19 = vpop.eup %2813 }
 0xcdc   :  { %v1495_v20 = vmul.f32 %v2814_v19, %v2812_v10 }
 0xcde   :  { %v1496_v21 = vpack.c.bf16 %v1495_v20, %v1495_v20 }
 0xce0   :  { %2524 = vmatmul.mubr.msk.bf16.vlgmr.msra.gmra.mrb[20].mxu1 %vm476_vm1, %v1496_v21 }
 0xce1   :  { %1917 = vmatprep.mubr.bf16.mxu1 %v3054_v29  ;;  %1886 = vmatpush1.bf16.msra.mxu1 %v2711_v0  ;;  %v2759_v0 = vld [vmem:[#allocation14 + $0xc0] sm:$0xff]  }
 0xce2   :  { %1887 = vmatprep.subr.bf16.mxu1 %v2719_v44  ;;  %v2774_v44 = vld [vmem:[#allocation14 + $0xb8] sm:$0xff]  }
 0xce5   :  { %1888 = vmatpush1.bf16.msra.mxu1 %v2717_v45 }
 0xdb3   :  { %v1534_v23 = vpop.f32.mrb[20].mxu1 }
 0xdb4   :  { %v1540_v24 = vpack.c.bf16 %v1534_v23, %v1534_v23  ;;  %v2525_v25 = vpop.f32.mrb[21].mxu1 }
 0xdb5   :  { %v1537_v26 = vpop.f32.mrb[22].mxu1 }
 0xdb6   :  { %v2526_v27 = vpop.f32.mrb[23].mxu1  ;;  %2544 = vmatmul.mubr.bf16.vlgmr.msra.gmra.mrb[24].mxu0 %v1540_v24 }
 0xdb7   :  { %1958 = vmatprep.mubr.bf16.mxu0 %v3054_v29  ;;  %1927 = vmatpush1.bf16.msra.mxu0 %v2714_v30  ;;  %v2761_v30 = vld [vmem:[#allocation14 + $0xc8] sm:$0xff]  }
 0xe89   :  { %v1640_v32 = vpop.f32.mrb[24].mxu0 }
 0xe8a   :  { %v1647_v33 = vrot.slane %v1640_v32, 1  ;;  %v1648_v34 = vrot.slane %v1640_v32, 2  ;;  %v2545_v35 = vpop.f32.mrb[25].mxu0  ;;  %v2763_v32 = vld [vmem:[#allocation14 + $0xd0] sm:$0xff]  }
 0xe8b   :  { %v1643_v36 = vpop.f32.mrb[26].mxu0  ;;  %v2766_v35 = vld [vmem:[#allocation14 + $0x98] sm:$0xff]  }
 0xe8c   :  { %v3363_v37 = vadd.f32 %v1647_v33, %v3312_v57  ;;  %v3366_v38 = vadd.f32 %v1648_v34, %v3315_v59  ;;  %v2546_v29 = vpop.f32.mrb[27].mxu0  ;;  %v2722_v57 = vld [vmem:[#allocation13 + $0x12c] ss:$16 sps:$4 sm:$0xff]   ;;  %v2725_v59 = vld [vmem:[#allocation13 + $0x144] ss:$16 sps:$4 sm:$0xff]  }
 0xe8d   :  { %1928 = vmatprep.subr.bf16.mxu0 %v2722_v57  ;;  %1889 = vmatprep.subr.bf16.mxu1 %v2725_v59  ;;  %v2764_v33 = vld [vmem:[#allocation14 + $0x90] sm:$0xff]   ;;  %v2765_v34 = vld [vmem:[#allocation14 + $0xd8] sm:$0xff]   ;;  %v2767_v36 = vld [vmem:[#allocation14 + $0xe0] sm:$0xff]  }
 0xe8e   :  { %v1653_v39 = vmul.f32 %v3363_v37, %v3363_v37  ;;  %v1654_v40 = vmul.f32 %v3366_v38, %v3366_v38  ;;  %1929 = vmatpush1.bf16.msra.mxu0 %v2720_v46  ;;  %1890 = vmatpush1.bf16.msra.mxu1 %v2723_v48  ;;  %v2768_v29 = vld [vmem:[#allocation14 + $0xa0] sm:$0xff]  }
 0xe8f   :  { %1930 = vmatprep.subr.bf16.mxu0 %v2728_v47  ;;  %1891 = vmatprep.subr.bf16.mxu1 %v2731_v51 }
 0xe90   :  { %v1661_v41 = vsel %vm1660_vm4, %v1653_v39, 0.0  ;;  %v1657_v42 = vrot.slane %v1654_v40, 7  ;;  %v2769_v39 = vld [vmem:[#allocation14 + $0xe8] sm:$0xff]  }
 0xe91   :  { %1662 = vadd.xlane.f32.xlu1 %v1661_v41  ;;  %v2770_v40 = vld [vmem:[#allocation14 + $0xa8] sm:$0xff]   ;;  %v2771_v41 = vld [vmem:[#allocation14 + $0xf0] sm:$0xff]  }
 0xe92   :  { %v1665_v43 = vsel %vm1664_vm5, %v1657_v42, 0.0  ;;  %1931 = vmatpush1.bf16.msra.mxu0 %v2726_v49  ;;  %1892 = vmatpush1.bf16.msra.mxu1 %v2729_v56  ;;  %v2772_v42 = vld [vmem:[#allocation14 + $0xb0] sm:$0xff]  }
 0xe93   :  { %1666 = vadd.xlane.f32.xlu0 %v1665_v43  ;;  %1932 = vmatprep.subr.bf16.mxu0 %v2734_v55  ;;  %v2773_v43 = vld [vmem:[#allocation14 + $0xf8] sm:$0xff]  }
 0xe94   :  { %1893 = vmatprep.subr.bf16.mxu1 %v2737_v60 }
 0xe96   :  { %1933 = vmatpush1.bf16.msra.mxu0 %v2732_v58  ;;  %1894 = vmatpush1.bf16.msra.mxu1 %v2735_v62 }
 0xe97   :  { %1934 = vmatprep.subr.bf16.mxu0 %v2740_v61  ;;  %1895 = vmatprep.subr.bf16.mxu1 %v2743_v3 }
 0xe9a   :  { %1935 = vmatpush1.bf16.msra.mxu0 %v2738_v63  ;;  %1896 = vmatpush1.bf16.msra.mxu1 %v2741_v50 }
 0xe9b   :  { %1936 = vmatprep.subr.bf16.mxu0 %v2746_v52  ;;  %1897 = vmatprep.subr.bf16.mxu1 %v2749_v54 }
 0xe9e   :  { %1937 = vmatpush1.bf16.msra.mxu0 %v2744_v53  ;;  %1898 = vmatpush1.bf16.msra.mxu1 %v2747_v4 }
 0xe9f   :  { %1938 = vmatprep.subr.bf16.mxu0 %v2752_v8  ;;  %1899 = vmatprep.subr.bf16.mxu1 %v2755_v5 }
 0xea2   :  { %1939 = vmatpush1.bf16.msra.mxu0 %v2750_v11  ;;  %1900 = vmatpush1.bf16.msra.mxu1 %v2753_v7 }
 0xea3   :  { %1940 = vmatprep.subr.bf16.mxu0 %v2758_v6  ;;  %2421 = vmatprep.subr.bf16.mxu1 %v2759_v0 }
 0xea6   :  { %1941 = vmatpush1.bf16.msra.mxu0 %v2756_v9 }
 0xf1e   :  { %v1663_v10 = vpop.xlane.xlu1 %1662 }
 0xf1f   :  { %v1668_v12 = vmul.f32 0.0078125, %v1663_v10 }
 0xf20   :  { %v1667_v13 = vpop.xlane.xlu0 %1666 }
 0xf21   :  { %v1670_v14 = vadd.f32 1e-06, %v1668_v12  ;;  %v1669_v15 = vmul.f32 0.0078125, %v1667_v13 }
 0xf23   :  { %2815 = vrsqrt.f32 %v1670_v14  ;;  %v1671_v16 = vadd.f32 1e-06, %v1669_v15 }
 0xf25   :  { %2817 = vrsqrt.f32 %v1671_v16 }
 0xf2d   :  { %v2816_v17 = vpop.eup %2815 }
 0xf2e   :  { %v1679_v18 = vmul.f32 %v2816_v17, %v3363_v37 }
 0xf2f   :  { %v2818_v1 = vpop.eup %2817 }
 0xf30   :  { %v1681_v2 = vpack.c.bf16 %v1679_v18, %v1679_v18  ;;  %v1676_v19 = vrot.slane %v2818_v1, 1 }
 0xf32   :  { %v1680_v20 = vmul.f32 %v1676_v19, %v3366_v38  ;;  %v1718_v22 = vunpack.c.l.b16 %v1681_v2 }
 0xf34   :  { %v1682_v21 = vpack.c.bf16 %v1680_v20, %v1680_v20  ;;  %v1720_v25 = vrot.slane %v1718_v22, 7 }
 0xf36   :  { %v1719_v23 = vunpack.c.l.b16 %v1682_v21 }
 0xf38   :  { %v1721_v24 = vrot.slane %v1719_v23, 6 }
 0xf3a   :  { %v1722_v26 = vsel %vm1440_vm2, %v1721_v24, %v1720_v25 }
 0xf3b   :  { %v1723_v27 = vpack.c.b16 %v1722_v26, %v1722_v26 }
 0xf3d   :  { %1918 = vmatmul.mubr.bf16.vlgmr.msra.gmra.mrb[24].mxu1 %v1723_v27  ;;  %1959 = vmatmul.mubr.bf16.vlgmr.msra.gmra.mrb[28].mxu0 %v1723_v27 }
 0xf3e   :  { %2422 = vmatpush3.bf16.msra.mxu1 %v2760_v28 }
 0xf3f   :  { %2423 = vmatprep.subr.bf16.mxu1 %v2761_v30 }
 0xf42   :  { %2424 = vmatpush3.bf16.msra.mxu1 %v2762_v31 }
 0xf43   :  { %2425 = vmatprep.subr.bf16.mxu1 %v2763_v32 }
 0xf46   :  { %2426 = vmatpush3.bf16.msra.mxu1 %v2764_v33 }
 0xf47   :  { %2427 = vmatprep.subr.bf16.mxu1 %v2765_v34 }
 0xf4a   :  { %2428 = vmatpush3.bf16.msra.mxu1 %v2766_v35 }
 0xf4b   :  { %2429 = vmatprep.subr.bf16.mxu1 %v2767_v36 }
 0xf4e   :  { %2430 = vmatpush3.bf16.msra.mxu1 %v2768_v29 }
 0xf4f   :  { %2431 = vmatprep.subr.bf16.mxu1 %v2769_v39 }
 0xf52   :  { %2432 = vmatpush3.bf16.msra.mxu1 %v2770_v40 }
 0xf53   :  { %2433 = vmatprep.subr.bf16.mxu1 %v2771_v41 }
 0xf56   :  { %2434 = vmatpush3.bf16.msra.mxu1 %v2772_v42 }
 0xf57   :  { %2435 = vmatprep.subr.bf16.mxu1 %v2773_v43 }
 0xf5a   :  { %2436 = vmatpush3.bf16.msra.mxu1 %v2774_v44 }
0x1010   :  { %v1919_v57 = vpop.f32.mrb[24].mxu1  ;;  %v1960_v45 = vpop.f32.mrb[28].mxu0 }
0x1011   :  { %v2337_v46 = vmul.f32 -1.442695, %v1919_v57  ;;  %v1921_v59 = vpop.f32.mrb[25].mxu1  ;;  %v1962_v47 = vpop.f32.mrb[29].mxu0 }
0x1012   :  { %v2338_v48 = vmul.f32 -1.442695, %v1921_v59  ;;  %v1923_v49 = vpop.f32.mrb[26].mxu1  ;;  %v1964_v51 = vpop.f32.mrb[30].mxu0 }
0x1013   :  { %2819 = vpow2.f32 %v2337_v46  ;;  %v1924_v55 = vpop.f32.mrb[27].mxu1  ;;  %v1965_v56 = vpop.f32.mrb[31].mxu0 }
0x1014   :  { %2821 = vpow2.f32 %v2338_v48 }
0x101d   :  { %v2820_v58 = vpop.eup %2819 }
0x101e   :  { %v2822_v60 = vpop.eup %2821  ;;  %v1973_v61 = vadd.f32 1.0, %v2820_v58 }
0x101f   :  { %v1974_v62 = vadd.f32 1.0, %v2822_v60 }
0x1020   :  { %2823 = vrcp.f32 %v1973_v61 }
0x1021   :  { %2825 = vrcp.f32 %v1974_v62 }
0x102a   :  { %v2824_v63 = vpop.eup %2823 }
0x102b   :  { %v2826_v3 = vpop.eup %2825  ;;  %v1979_v52 = vmul.f32 %v2824_v63, %v1919_v57 }
0x102c   :  { %v1980_v50 = vmul.f32 %v2826_v3, %v1921_v59 }
0x102d   :  { %v1981_v53 = vmul.f32 %v1979_v52, %v1960_v45 }
0x102e   :  { %v1982_v54 = vmul.f32 %v1980_v50, %v1962_v47 }
0x102f   :  { %v1983_v4 = vpack.c.bf16 %v1981_v53, %v1981_v53 }
0x1030   :  { %v1984_v8 = vpack.c.bf16 %v1982_v54, %v1982_v54 }
0x1032   :  { %2146 = vmatprep.mubr.bf16.mxu1 %v1984_v8 }
0x1033   :  { %2147 = vmatmul.mubr.bf16.vlgmr.msra.gmra.mrb[28].mxu1 %v1983_v4 }
0x1106   :  { %v2437_v11 = vpop.f32.mrb[28].mxu1 }
0x1107   :  { %v2438_v5 = vpop.f32.mrb[29].mxu1 }
0x1108   :  { %v2439_v6 = vadd.f32 %v2438_v5, %v2437_v11  ;;  %v2440_v7 = vpop.f32.mrb[30].mxu1 }
0x1109   :  { %v2441_v9 = vpop.f32.mrb[31].mxu1 }
0x110a   :  { %v2155_v10 = vrot.slane %v2439_v6, 1  ;;  %v2156_v12 = vrot.slane %v2439_v6, 2 }
0x110c   :  { %v2159_v13 = vadd.f32 %v2155_v10, %v3363_v37  ;;  %v2160_v14 = vadd.f32 %v2156_v12, %v3366_v38 }
0x110e   :  { %v2163_v15 = vrot.slane %v2160_v14, 7  ;;  %2166 = vst [vmem:[#allocation16 - $0x7] sm:$0x80] %v2159_v13 }
0x1110   :  { %2167 = vst [vmem:[#allocation16 + $0x1] sm:$0x1] %v2163_v15 }
0x1111   :  { %3014 = shalt.err (!%p3011_p12)
}
0x1112   :  { %s3015_s25 = scalar_lea.hbm %s3398_s9, 32 }
0x1113   :  { %p3016_p13 = scmp.ne.s32.totalorder %s3398_s9, %s3015_s25  ;;  %p3019_p0 = scmp.lt.u32.totalorder %s3015_s25, %s3398_s9 }
0x1115   :  { %p3021_p1 = pnand %p3019_p0, %p3016_p13 }
0x1117   :  { %3024 = shalt.err (!%p3021_p1)
}
0x1118   :  { %2177 = dma.vmem_to_hbm [thread:$0]  %s2175_s12, 32, %s3398_s9, [#allocation4]  }
0x1119   :  { %3035 = dma.done.wait [#allocation4], 32  }
0x111a   :  { %3036 = vsyncadd [#allocation4], 4294967264 }
0x111b   :  { %2181 = vsyncpa [#allocation3], 1 }
0x111c   :  { %2182 = vsyncpa [#allocation6], 1 }
0x111d   :  { %2183 = vsyncpa [#allocation9], 1 }
0x111e   :  { %2184 = vsyncpa [#allocation12], 1 }
0x111f   :  { %2185 = vsyncpa [#allocation15], 1 }
0x1120   :  { %2186 = vsyncpa [#allocation4], 1 }

</bundles_post_ra>
